<compile_context>
chip_gen: v6e
topology: v6e:2x2x1
jax: 0.10.0
libtpu: 0.0.40
codegen_flags: <defaults>
</compile_context>

<pallas_src>
import functools

import jax
import jax.numpy as jnp
import numpy as np
from jax.experimental import pallas as pl
from jax.experimental.pallas import tpu as pltpu


def _round_up(x: int, m: int) -> int:
    return (x + m - 1) // m * m


def _pick_band_rows(h: int, w: int, n: int, target_pixels: int = 2048) -> int:
    """Rows per band: big work units (~2k px), but >=2 bands when batch==1 (v7x 2 TCs)."""
    bh = max(1, min(h, target_pixels // max(w, 1)))
    if n == 1 and bh >= h and h > 1:
        bh = (h + 1) // 2        # split single-image work so both TensorCores stay busy
    return bh


# ----------------------------------------------------------------------------
# Kernel 1: per-band 3x3 conv (9 shifted-slice matmuls over a halo'd NHWC band)
#           + bias + ReLU + partial global-average-pool sum.
# Grid = (batch * n_bands,), fully "parallel" (no carried state).
# ----------------------------------------------------------------------------
def conv_gap_band_kernel(x_ref, cw_ref, cb_ref, part_ref, *, bh, w, c_in, h, n_bands):
    xb = x_ref[0]                                 # [bh+2, w+2, c_in]  bf16 (1-px halo)
    cw = cw_ref[...]                              # [9*c_in, cmid_pad] bf16
    m = bh * w
    feat = jnp.zeros((m, cb_ref.shape[-1]), jnp.float32)
    for di in range(3):
        for dj in range(3):
            # Shifted window for tap (di, dj): no HBM im2col, 9x blowup lives only in vregs.
            tap = xb[di:di + bh, dj:dj + w, :].reshape(m, c_in)           # [m, c_in] bf16
            wk = cw[(di * 3 + dj) * c_in:(di * 3 + dj + 1) * c_in, :]      # [c_in, cmid_pad]
            feat = feat + jnp.dot(tap, wk, preferred_element_type=jnp.float32)
    feat = jnp.maximum(feat + cb_ref[...], 0.0)                            # bias + ReLU, f32

    if bh * n_bands != h:
        # Short final band: mask rows past the true image height.
        # (Only traced when H does not divide evenly into bands.)
        r = pl.program_id(0) % n_bands
        rows_valid = jnp.minimum(bh, h - r * bh)
        pix = jax.lax.broadcasted_iota(jnp.int32, (m, 1), 0)
        feat = jnp.where(pix < rows_valid * w, feat, 0.0)

    # Partial GAP: column sums of this band (XLU reduce; cheap next to the MXU matmuls).
    part_ref[0] = jnp.sum(feat, axis=0, keepdims=True)                     # [1, cmid_pad]


# ----------------------------------------------------------------------------
# Kernel 2: band-sum -> mean -> fc head, all in f32, single whole-array invocation.
# ----------------------------------------------------------------------------
def gap_fc_kernel(parts_ref, fw_ref, fb_ref, o_ref, *, inv_hw):
    pooled = jnp.sum(parts_ref[...], axis=1) * inv_hw                      # [n_pad, cmid_pad]
    o_ref[...] = (jnp.dot(pooled, fw_ref[...], preferred_element_type=jnp.float32)
                  + fb_ref[...])


def base_model_forward(x_nchw, params, band_rows=None):
    """Forward matching BaseModel semantics: features -> global avg pool -> fc(num_classes)."""
    conv_w = params["conv_w"]          # [9*Cin, Cmid]   (f32, PyTorch-layout-compatible)
    conv_b = params["conv_b"]          # [1, Cmid]
    fc_w = params["fc_w"]              # [Cmid, num_classes]
    fc_b = params["fc_b"]              # [1, num_classes]

    n, c_in, h, w = x_nchw.shape
    k9, c_mid = conv_w.shape
    num_classes = fc_w.shape[1]
    assert k9 == 9 * c_in, "conv_w must be [9*Cin, Cmid]"

    cmid_pad = _round_up(c_mid, 128)        # lane-dense hidden width (use 256 for real widths)
    ncls_pad = _round_up(num_classes, 128)  # lane-dense class width
    n_pad = _round_up(max(n, 8), 8)         # sublane-dense M rows for the fc matmul

    bh = _pick_band_rows(h, w, n) if band_rows is None else min(int(band_rows), h)
    n_bands = pl.cdiv(h, bh)
    n_total = n * n_bands
    h_full = n_bands * bh

    # ---- layout prep (no 9x im2col): NCHW -> NHWC bf16, 1-px conv pad, halo'd row bands ----
    x_nhwc = jnp.transpose(x_nchw, (0, 2, 3, 1)).astype(jnp.bfloat16)
    xp = jnp.pad(x_nhwc, ((0, 0), (1, 1 + h_full - h), (1, 1), (0, 0)))
    bands = jnp.stack([xp[:, r * bh:r * bh + bh + 2] for r in range(n_bands)], axis=1)
    xb = bands.reshape(n_total, bh + 2, w + 2, c_in)      # [N*bands, bh+2, W+2, Cin] bf16

    cw = jnp.pad(conv_w, ((0, 0), (0, cmid_pad - c_mid))).astype(jnp.bfloat16)
    cb = jnp.pad(conv_b, ((0, 0), (0, cmid_pad - c_mid))).astype(jnp.float32)
    fw = jnp.pad(fc_w, ((0, cmid_pad - c_mid), (0, ncls_pad - num_classes))).astype(jnp.float32)
    fb = jnp.pad(fc_b, ((0, 0), (0, ncls_pad - num_classes))).astype(jnp.float32)

    conv_flops = 2 * n_total * (bh * w) * k9 * cmid_pad + 2 * n_total * (bh * w) * cmid_pad
    conv_bytes = xb.size * 2 + cw.size * 2 + cb.size * 4 + n_total * cmid_pad * 4

    # ---- kernel 1: per-band conv + bias + ReLU + partial GAP sums (one parallel grid axis) ----
    partials = pl.pallas_call(
        functools.partial(conv_gap_band_kernel,
                          bh=bh, w=w, c_in=c_in, h=h, n_bands=n_bands),
        out_shape=jax.ShapeDtypeStruct((n_total, 1, cmid_pad), jnp.float32),
        grid=(n_total,),
        in_specs=[
            pl.BlockSpec((1, bh + 2, w + 2, c_in), lambda i: (i, 0, 0, 0)),   # halo'd band
            pl.BlockSpec((k9, cmid_pad), lambda i: (0, 0)),                    # conv weight
            pl.BlockSpec((1, cmid_pad), lambda i: (0, 0)),                     # conv bias
        ],
        out_specs=pl.BlockSpec((1, 1, cmid_pad), lambda i: (i, 0, 0)),
        compiler_params=pltpu.CompilerParams(
            dimension_semantics=("parallel",),            # megacore-sharded on v7x
            vmem_limit_bytes=32 * 1024 * 1024,
        ),
        cost_estimate=pl.CostEstimate(
            flops=int(conv_flops), transcendentals=0, bytes_accessed=int(conv_bytes)),
    )(xb, cw, cb)

    # ---- kernel 2: band-sum + mean + fc head in f32 (tiny; batches all images at once) ----
    parts = partials.reshape(n, n_bands, cmid_pad)
    parts = jnp.pad(parts, ((0, n_pad - n), (0, 0), (0, 0)))
    logits_pad = pl.pallas_call(
        functools.partial(gap_fc_kernel, inv_hw=1.0 / float(h * w)),
        out_shape=jax.ShapeDtypeStruct((n_pad, ncls_pad), jnp.float32),
    )(parts, fw, fb)

    return logits_pad[:n, :num_classes]


def reference_forward(x_nchw, params):
    """Plain-JAX f32 reference for correctness checking."""
    x = jnp.transpose(x_nchw, (0, 2, 3, 1)).astype(jnp.float32)
    n, h, w, c = x.shape
    xp = jnp.pad(x, ((0, 0), (1, 1), (1, 1), (0, 0)))
    taps = [xp[:, di:di + h, dj:dj + w, :] for di in range(3) for dj in range(3)]
    patches = jnp.concatenate(taps, axis=-1).reshape(n, h * w, 9 * c)
    feat = jnp.maximum(
        jnp.einsum("nmk,kc->nmc", patches, params["conv_w"]) + params["conv_b"], 0.0)
    pooled = feat.mean(axis=1)
    return pooled @ params["fc_w"] + params["fc_b"]


def init_params(key, c_in=4, c_mid=32, num_classes=10):
    k1, k2, k3, k4 = jax.random.split(key, 4)
    conv_w = jax.random.normal(k1, (3 * 3 * c_in, c_mid), jnp.float32) * 0.05
    conv_b = jax.random.normal(k2, (1, c_mid), jnp.float32) * 0.01
    fc_w = jax.random.normal(k3, (c_mid, num_classes), jnp.float32) * 0.05
    fc_b = jax.random.normal(k4, (1, num_classes), jnp.float32) * 0.01
    return {"conv_w": conv_w, "conv_b": conv_b, "fc_w": fc_w, "fc_b": fc_b}


if __name__ == "__main__":
    key = jax.random.PRNGKey(0)
    k_x, k_p = jax.random.split(key)

    # Small deterministic input, PyTorch NCHW convention: [batch=2, C=4, H=16, W=16]
    x = jax.random.normal(k_x, (2, 4, 16, 16), jnp.float32)
    params = init_params(k_p, c_in=4, c_mid=32, num_classes=10)

    fwd = jax.jit(base_model_forward, static_argnames=("band_rows",))
    ref = np.asarray(reference_forward(x, params))

    # Default banding: whole 16x16 image per grid step (grid = batch; both v7x cores busy).
    out = fwd(x, params)
    jax.block_until_ready(out)
    assert out.shape == (2, 10) and out.dtype == jnp.float32
    assert np.allclose(np.asarray(out), ref, rtol=2e-2, atol=2e-2), (
        float(np.max(np.abs(np.asarray(out) - ref))))

    # Exercise the multi-band path (2 exact bands) and the masked short-final-band path
    # (3 bands of 7 rows covering 16 rows).
    for band_rows in (8, 7):
        out_b = np.asarray(fwd(x, params, band_rows=band_rows))
        assert np.allclose(out_b, ref, rtol=2e-2, atol=2e-2), (
            band_rows, float(np.max(np.abs(out_b - ref))))

    print("KERNEL_OK")
</pallas_src>

<mosaic_0001>
module attributes {stable_mosaic.version = 11 : i64} {
  func.func @conv_gap_band_kernel(%arg0: i32, %arg1: memref<1x18x18x4xbf16, #tpu.memory_space<vmem>>, %arg2: memref<36x128xbf16, #tpu.memory_space<vmem>>, %arg3: memref<1x128xf32, #tpu.memory_space<vmem>>, %arg4: memref<1x1x128xf32, #tpu.memory_space<vmem>>) attributes {dimension_semantics = [#tpu.dimension_semantics<parallel>], iteration_bounds = array<i64: 2>, scalar_prefetch = 0 : i64, scratch_operands = 0 : i64, tpu.core_type = #tpu.core_type<tc>, window_params = [{transform_indices = @transform_0, window_bounds = array<i64: 1, 18, 18, 4>}, {pipeline_mode = #tpu.pipeline_mode<synchronous>, transform_indices = @transform_1, window_bounds = array<i64: 36, 128>}, {pipeline_mode = #tpu.pipeline_mode<synchronous>, transform_indices = @transform_2, window_bounds = array<i64: 1, 128>}, {transform_indices = @transform_3, window_bounds = array<i64: 1, 1, 128>}]} {
    %c0 = arith.constant 0 : index
    %c0_0 = arith.constant 0 : index
    %c0_1 = arith.constant 0 : index
    %c0_2 = arith.constant 0 : index
    %0 = vector.load %arg1[%c0, %c0_0, %c0_1, %c0_2] : memref<1x18x18x4xbf16, #tpu.memory_space<vmem>>, vector<1x18x18x4xbf16>
    %1 = vector.shape_cast %0 : vector<1x18x18x4xbf16> to vector<18x18x4xbf16>
    %c0_3 = arith.constant 0 : index
    %c0_4 = arith.constant 0 : index
    %2 = vector.load %arg2[%c0_3, %c0_4] : memref<36x128xbf16, #tpu.memory_space<vmem>>, vector<36x128xbf16>
    %cst = arith.constant 0.000000e+00 : f32
    %3 = vector.broadcast %cst : f32 to vector<256x128xf32>
    %4 = vector.extract_strided_slice %1 {offsets = [0, 0, 0], sizes = [16, 16, 4], strides = [1, 1, 1]} : vector<18x18x4xbf16> to vector<16x16x4xbf16>
    %5 = vector.shape_cast %4 : vector<16x16x4xbf16> to vector<256x4xbf16>
    %6 = vector.extract_strided_slice %2 {offsets = [0, 0], sizes = [4, 128], strides = [1, 1]} : vector<36x128xbf16> to vector<4x128xbf16>
    %cst_5 = arith.constant dense<0.000000e+00> : vector<256x128xf32>
    %7 = tpu.matmul %5, %6, %cst_5 {dimension_numbers = #tpu.dot_dimension_numbers<[1], [0], [0], [1], [0, 0, 1, 1], [], []>} : vector<256x4xbf16>, vector<4x128xbf16>, vector<256x128xf32> -> vector<256x128xf32>
    %8 = arith.addf %3, %7 : vector<256x128xf32>
    %9 = vector.extract_strided_slice %1 {offsets = [0, 1, 0], sizes = [16, 16, 4], strides = [1, 1, 1]} : vector<18x18x4xbf16> to vector<16x16x4xbf16>
    %10 = vector.shape_cast %9 : vector<16x16x4xbf16> to vector<256x4xbf16>
    %11 = vector.extract_strided_slice %2 {offsets = [4, 0], sizes = [4, 128], strides = [1, 1]} : vector<36x128xbf16> to vector<4x128xbf16>
    %cst_6 = arith.constant dense<0.000000e+00> : vector<256x128xf32>
    %12 = tpu.matmul %10, %11, %cst_6 {dimension_numbers = #tpu.dot_dimension_numbers<[1], [0], [0], [1], [0, 0, 1, 1], [], []>} : vector<256x4xbf16>, vector<4x128xbf16>, vector<256x128xf32> -> vector<256x128xf32>
    %13 = arith.addf %8, %12 : vector<256x128xf32>
    %14 = vector.extract_strided_slice %1 {offsets = [0, 2, 0], sizes = [16, 16, 4], strides = [1, 1, 1]} : vector<18x18x4xbf16> to vector<16x16x4xbf16>
    %15 = vector.shape_cast %14 : vector<16x16x4xbf16> to vector<256x4xbf16>
    %16 = vector.extract_strided_slice %2 {offsets = [8, 0], sizes = [4, 128], strides = [1, 1]} : vector<36x128xbf16> to vector<4x128xbf16>
    %cst_7 = arith.constant dense<0.000000e+00> : vector<256x128xf32>
    %17 = tpu.matmul %15, %16, %cst_7 {dimension_numbers = #tpu.dot_dimension_numbers<[1], [0], [0], [1], [0, 0, 1, 1], [], []>} : vector<256x4xbf16>, vector<4x128xbf16>, vector<256x128xf32> -> vector<256x128xf32>
    %18 = arith.addf %13, %17 : vector<256x128xf32>
    %19 = vector.extract_strided_slice %1 {offsets = [1, 0, 0], sizes = [16, 16, 4], strides = [1, 1, 1]} : vector<18x18x4xbf16> to vector<16x16x4xbf16>
    %20 = vector.shape_cast %19 : vector<16x16x4xbf16> to vector<256x4xbf16>
    %21 = vector.extract_strided_slice %2 {offsets = [12, 0], sizes = [4, 128], strides = [1, 1]} : vector<36x128xbf16> to vector<4x128xbf16>
    %cst_8 = arith.constant dense<0.000000e+00> : vector<256x128xf32>
    %22 = tpu.matmul %20, %21, %cst_8 {dimension_numbers = #tpu.dot_dimension_numbers<[1], [0], [0], [1], [0, 0, 1, 1], [], []>} : vector<256x4xbf16>, vector<4x128xbf16>, vector<256x128xf32> -> vector<256x128xf32>
    %23 = arith.addf %18, %22 : vector<256x128xf32>
    %24 = vector.extract_strided_slice %1 {offsets = [1, 1, 0], sizes = [16, 16, 4], strides = [1, 1, 1]} : vector<18x18x4xbf16> to vector<16x16x4xbf16>
    %25 = vector.shape_cast %24 : vector<16x16x4xbf16> to vector<256x4xbf16>
    %26 = vector.extract_strided_slice %2 {offsets = [16, 0], sizes = [4, 128], strides = [1, 1]} : vector<36x128xbf16> to vector<4x128xbf16>
    %cst_9 = arith.constant dense<0.000000e+00> : vector<256x128xf32>
    %27 = tpu.matmul %25, %26, %cst_9 {dimension_numbers = #tpu.dot_dimension_numbers<[1], [0], [0], [1], [0, 0, 1, 1], [], []>} : vector<256x4xbf16>, vector<4x128xbf16>, vector<256x128xf32> -> vector<256x128xf32>
    %28 = arith.addf %23, %27 : vector<256x128xf32>
    %29 = vector.extract_strided_slice %1 {offsets = [1, 2, 0], sizes = [16, 16, 4], strides = [1, 1, 1]} : vector<18x18x4xbf16> to vector<16x16x4xbf16>
    %30 = vector.shape_cast %29 : vector<16x16x4xbf16> to vector<256x4xbf16>
    %31 = vector.extract_strided_slice %2 {offsets = [20, 0], sizes = [4, 128], strides = [1, 1]} : vector<36x128xbf16> to vector<4x128xbf16>
    %cst_10 = arith.constant dense<0.000000e+00> : vector<256x128xf32>
    %32 = tpu.matmul %30, %31, %cst_10 {dimension_numbers = #tpu.dot_dimension_numbers<[1], [0], [0], [1], [0, 0, 1, 1], [], []>} : vector<256x4xbf16>, vector<4x128xbf16>, vector<256x128xf32> -> vector<256x128xf32>
    %33 = arith.addf %28, %32 : vector<256x128xf32>
    %34 = vector.extract_strided_slice %1 {offsets = [2, 0, 0], sizes = [16, 16, 4], strides = [1, 1, 1]} : vector<18x18x4xbf16> to vector<16x16x4xbf16>
    %35 = vector.shape_cast %34 : vector<16x16x4xbf16> to vector<256x4xbf16>
    %36 = vector.extract_strided_slice %2 {offsets = [24, 0], sizes = [4, 128], strides = [1, 1]} : vector<36x128xbf16> to vector<4x128xbf16>
    %cst_11 = arith.constant dense<0.000000e+00> : vector<256x128xf32>
    %37 = tpu.matmul %35, %36, %cst_11 {dimension_numbers = #tpu.dot_dimension_numbers<[1], [0], [0], [1], [0, 0, 1, 1], [], []>} : vector<256x4xbf16>, vector<4x128xbf16>, vector<256x128xf32> -> vector<256x128xf32>
    %38 = arith.addf %33, %37 : vector<256x128xf32>
    %39 = vector.extract_strided_slice %1 {offsets = [2, 1, 0], sizes = [16, 16, 4], strides = [1, 1, 1]} : vector<18x18x4xbf16> to vector<16x16x4xbf16>
    %40 = vector.shape_cast %39 : vector<16x16x4xbf16> to vector<256x4xbf16>
    %41 = vector.extract_strided_slice %2 {offsets = [28, 0], sizes = [4, 128], strides = [1, 1]} : vector<36x128xbf16> to vector<4x128xbf16>
    %cst_12 = arith.constant dense<0.000000e+00> : vector<256x128xf32>
    %42 = tpu.matmul %40, %41, %cst_12 {dimension_numbers = #tpu.dot_dimension_numbers<[1], [0], [0], [1], [0, 0, 1, 1], [], []>} : vector<256x4xbf16>, vector<4x128xbf16>, vector<256x128xf32> -> vector<256x128xf32>
    %43 = arith.addf %38, %42 : vector<256x128xf32>
    %44 = vector.extract_strided_slice %1 {offsets = [2, 2, 0], sizes = [16, 16, 4], strides = [1, 1, 1]} : vector<18x18x4xbf16> to vector<16x16x4xbf16>
    %45 = vector.shape_cast %44 : vector<16x16x4xbf16> to vector<256x4xbf16>
    %46 = vector.extract_strided_slice %2 {offsets = [32, 0], sizes = [4, 128], strides = [1, 1]} : vector<36x128xbf16> to vector<4x128xbf16>
    %cst_13 = arith.constant dense<0.000000e+00> : vector<256x128xf32>
    %47 = tpu.matmul %45, %46, %cst_13 {dimension_numbers = #tpu.dot_dimension_numbers<[1], [0], [0], [1], [0, 0, 1, 1], [], []>} : vector<256x4xbf16>, vector<4x128xbf16>, vector<256x128xf32> -> vector<256x128xf32>
    %48 = arith.addf %43, %47 : vector<256x128xf32>
    %c0_14 = arith.constant 0 : index
    %c0_15 = arith.constant 0 : index
    %49 = vector.load %arg3[%c0_14, %c0_15] : memref<1x128xf32, #tpu.memory_space<vmem>>, vector<1x128xf32>
    %50 = vector.broadcast %49 : vector<1x128xf32> to vector<256x128xf32>
    %51 = arith.addf %48, %50 : vector<256x128xf32>
    %cst_16 = arith.constant 0.000000e+00 : f32
    %52 = vector.broadcast %cst_16 : f32 to vector<256x128xf32>
    %53 = arith.maximumf %51, %52 : vector<256x128xf32>
    %cst_17 = arith.constant dense<0.000000e+00> : vector<128xf32>
    %54 = vector.multi_reduction <add>, %53, %cst_17 [0] : vector<256x128xf32> to vector<128xf32>
    %55 = vector.shape_cast %54 : vector<128xf32> to vector<1x128xf32>
    %c0_18 = arith.constant 0 : index
    %c0_19 = arith.constant 0 : index
    %c0_20 = arith.constant 0 : index
    %56 = vector.load %arg4[%c0_18, %c0_19, %c0_20] : memref<1x1x128xf32, #tpu.memory_space<vmem>>, vector<1x1x128xf32>
    %57 = vector.shape_cast %56 : vector<1x1x128xf32> to vector<1x128xf32>
    %58 = vector.shape_cast %55 : vector<1x128xf32> to vector<1x1x128xf32>
    tpu.vector_store %arg4[%c0_18, %c0_19, %c0_20], %58 {strides = array<i32>} : memref<1x1x128xf32, #tpu.memory_space<vmem>>, vector<1x1x128xf32>,
    return
  }
  func.func @transform_0(%arg0: i32) -> (i32, i32, i32, i32) {
    %c0_i32 = arith.constant 0 : i32
    %c0_i32_0 = arith.constant 0 : i32
    %c0_i32_1 = arith.constant 0 : i32
    %c0_i32_2 = arith.constant 0 : i32
    return %arg0, %c0_i32, %c0_i32_0, %c0_i32_1 : i32, i32, i32, i32
  }
  func.func @transform_1(%arg0: i32) -> (i32, i32) {
    %c0_i32 = arith.constant 0 : i32
    %c0_i32_0 = arith.constant 0 : i32
    %c0_i32_1 = arith.constant 0 : i32
    return %c0_i32, %c0_i32_0 : i32, i32
  }
  func.func @transform_2(%arg0: i32) -> (i32, i32) {
    %c0_i32 = arith.constant 0 : i32
    %c0_i32_0 = arith.constant 0 : i32
    %c0_i32_1 = arith.constant 0 : i32
    return %c0_i32, %c0_i32_0 : i32, i32
  }
  func.func @transform_3(%arg0: i32) -> (i32, i32, i32) {
    %c0_i32 = arith.constant 0 : i32
    %c0_i32_0 = arith.constant 0 : i32
    %c0_i32_1 = arith.constant 0 : i32
    return %arg0, %c0_i32, %c0_i32_0 : i32, i32, i32
  }
}

module attributes {stable_mosaic.version = 11 : i64} {
  func.func @gap_fc_kernel(%arg0: memref<8x1x128xf32, #tpu.memory_space<vmem>>, %arg1: memref<128x128xf32, #tpu.memory_space<vmem>>, %arg2: memref<1x128xf32, #tpu.memory_space<vmem>>, %arg3: memref<8x128xf32, #tpu.memory_space<vmem>>) attributes {dimension_semantics = [], scalar_prefetch = 0 : i64, scratch_operands = 0 : i64, tpu.core_type = #tpu.core_type<tc>} {
    %c0 = arith.constant 0 : index
    %c0_0 = arith.constant 0 : index
    %c0_1 = arith.constant 0 : index
    %0 = vector.load %arg0[%c0, %c0_0, %c0_1] : memref<8x1x128xf32, #tpu.memory_space<vmem>>, vector<8x1x128xf32>
    %cst = arith.constant dense<0.000000e+00> : vector<8x128xf32>
    %1 = vector.multi_reduction <add>, %0, %cst [1] : vector<8x1x128xf32> to vector<8x128xf32>
    %cst_2 = arith.constant 3.906250e-03 : f32
    %2 = vector.broadcast %cst_2 : f32 to vector<8x128xf32>
    %3 = arith.mulf %1, %2 : vector<8x128xf32>
    %c0_3 = arith.constant 0 : index
    %c0_4 = arith.constant 0 : index
    %4 = vector.load %arg1[%c0_3, %c0_4] : memref<128x128xf32, #tpu.memory_space<vmem>>, vector<128x128xf32>
    %cst_5 = arith.constant dense<0.000000e+00> : vector<8x128xf32>
    %5 = tpu.matmul %3, %4, %cst_5 {dimension_numbers = #tpu.dot_dimension_numbers<[1], [0], [0], [1], [0, 0, 1, 1], [], []>} : vector<8x128xf32>, vector<128x128xf32>, vector<8x128xf32> -> vector<8x128xf32>
    %c0_6 = arith.constant 0 : index
    %c0_7 = arith.constant 0 : index
    %6 = vector.load %arg2[%c0_6, %c0_7] : memref<1x128xf32, #tpu.memory_space<vmem>>, vector<1x128xf32>
    %7 = vector.broadcast %6 : vector<1x128xf32> to vector<8x128xf32>
    %8 = arith.addf %5, %7 : vector<8x128xf32>
    %c0_8 = arith.constant 0 : index
    %c0_9 = arith.constant 0 : index
    %9 = vector.load %arg3[%c0_8, %c0_9] : memref<8x128xf32, #tpu.memory_space<vmem>>, vector<8x128xf32>
    tpu.vector_store %arg3[%c0_8, %c0_9], %8 {strides = array<i32>} : memref<8x128xf32, #tpu.memory_space<vmem>>, vector<8x128xf32>,
    return
  }
}

</mosaic_0001>

<bundles_post_ra>
// kernel: base_model_forward.3
= control target key start
LH: loop header
LB: loop body
LE: loop exit
PB: predicated region body
PF: predicated region fallthrough
CT: control target
= control target key end

     0   :  { %v250_v0 = vmov 0.0   ;;  %vm251_vm0 = vmmov 0   ;;  %v76_v3 = vlaneseq  ;;  %v252_v5 = vmov 1966171168   ;;  %s368_s1 = inlined_call_operand.vmem [shape: f32[128,128], index: 1, kind: input, shape index: {}]   ;;  %s369_s0 = inlined_call_operand.vmem [shape: f32[8,1,128], index: 0, kind: input, shape index: {}]   ;;  %s370_s2 = inlined_call_operand.vmem [shape: f32[1,128], index: 2, kind: input, shape index: {}]   ;;  %s371_s3 = inlined_call_operand.vmem [shape: f32[8,128], index: 3, kind: output, shape index: {}]  }
   0x1   :  { %212 = vmatprep.subr.mxu0 %v250_v0  ;;  %v53_v1 = vld [vmem:[%s368_s1 + $0x78] sm:$0xff]  ;;  %v52_v2 = vld [vmem:[%s368_s1 + $0x70] sm:$0xff]  ;;  %244 = vmatprep.mubr.msk.f32.mxu0 %vm251_vm0, %v250_v0  ;;  %v51_v4 = vld [vmem:[%s368_s1 + $0x68] sm:$0xff]  ;;  %v74_v6 = vunpack.c.l.s4 %v252_v5 }
   0x2   :  { %213 = vmatpush3.msra.mxu0 %v53_v1  ;;  %v50_v7 = vld [vmem:[%s368_s1 + $0x60] sm:$0xff]  ;;  %v49_v8 = vld [vmem:[%s368_s1 + $0x58] sm:$0xff]  ;;  %v77_v11 = vshrl.u32 %v76_v3, 7  ;;  %v48_v19 = vld [vmem:[%s368_s1 + $0x50] sm:$0xff] }
   0x3   :  { %214 = vmatprep.subr.mxu0 %v250_v0  ;;  %v14_v9 = vld [vmem:[%s369_s0] sm:$0x1]  ;;  %v15_v10 = vld [vmem:[%s369_s0 + $0x1] sm:$0x1]  ;;  %v16_v12 = vld [vmem:[%s369_s0 + $0x2] sm:$0x1]  ;;  %v75_v18 = vunpack.c.0.s8 %v74_v6 }
   0x4   :  { %215 = vmatpush3.msra.mxu0 %v52_v2  ;;  %v17_v13 = vld [vmem:[%s369_s0 + $0x3] sm:$0x1]  ;;  %v18_v14 = vld [vmem:[%s369_s0 + $0x4] sm:$0x1]  ;;  %v19_v15 = vld [vmem:[%s369_s0 + $0x5] sm:$0x1] }
   0x5   :  { %216 = vmatprep.subr.mxu0 %v250_v0  ;;  %v20_v16 = vld [vmem:[%s369_s0 + $0x6] sm:$0x1]  ;;  %v21_v17 = vld [vmem:[%s369_s0 + $0x7] sm:$0x1]  ;;  %v30_v20 = vmul.f32 0.00390625, %v14_v9  ;;  %v31_v21 = vmul.f32 0.00390625, %v15_v10  ;;  %v78_v29 = vsub.s32 %v75_v18, %v77_v11 }
   0x6   :  { %217 = vmatpush3.msra.mxu0 %v51_v4  ;;  %v32_v22 = vmul.f32 0.00390625, %v16_v12  ;;  %v33_v23 = vmul.f32 0.00390625, %v17_v13  ;;  %v34_v24 = vmul.f32 0.00390625, %v18_v14  ;;  %v35_v25 = vmul.f32 0.00390625, %v19_v15  ;;  %v47_v28 = vld [vmem:[%s368_s1 + $0x48] sm:$0xff]  ;;  %v46_v30 = vld [vmem:[%s368_s1 + $0x40] sm:$0xff] }
   0x7   :  { %218 = vmatprep.subr.mxu0 %v250_v0  ;;  %v36_v26 = vmul.f32 0.00390625, %v20_v16  ;;  %v37_v27 = vmul.f32 0.00390625, %v21_v17  ;;  %v69_v31 = vcombine.low %v30_v20, %v31_v21  ;;  %v45_v35 = vld [vmem:[%s368_s1 + $0x38] sm:$0xff]  ;;  %v44_v36 = vld [vmem:[%s368_s1 + $0x30] sm:$0xff]  ;;  %v43_v41 = vld [vmem:[%s368_s1 + $0x28] sm:$0xff] }
   0x8   :  { %219 = vmatpush3.msra.mxu0 %v50_v7  ;;  %v70_v32 = vcombine.low %v32_v22, %v33_v23  ;;  %v71_v33 = vcombine.low %v34_v24, %v35_v25  ;;  %v42_v42 = vld [vmem:[%s368_s1 + $0x20] sm:$0xff]  ;;  %v41_v45 = vld [vmem:[%s368_s1 + $0x18] sm:$0xff]  ;;  %v40_v46 = vld [vmem:[%s368_s1 + $0x10] sm:$0xff] }
   0x9   :  { %220 = vmatprep.subr.mxu0 %v250_v0  ;;  %v72_v34 = vcombine.low %v36_v26, %v37_v27  ;;  %v79_v37 = vrot.slane %v69_v31, %v78_v29  ;;  %v39_v49 = vld [vmem:[%s368_s1 + $0x8] sm:$0xff]  ;;  %v38_v50 = vld [vmem:[%s368_s1] sm:$0xff] }
   0xa   :  { %221 = vmatpush3.msra.mxu0 %v49_v8  ;;  %v86_v38 = vrot.slane %v70_v32, %v78_v29  ;;  %v93_v39 = vrot.slane %v71_v33, %v78_v29  ;;  %v194_v52 = vld [vmem:[%s370_s2] ss:$0 sm:$0xff] }
   0xb   :  { %222 = vmatprep.subr.mxu0 %v250_v0  ;;  %v100_v40 = vrot.slane %v72_v34, %v78_v29 }
   0xc   :  { %223 = vmatpush3.msra.mxu0 %v48_v19  ;;  %v101_v43 = vcombine.low %v79_v37, %v86_v38 }
   0xd   :  { %224 = vmatprep.subr.mxu0 %v250_v0  ;;  %v102_v44 = vcombine.low %v93_v39, %v100_v40 }
   0xe   :  { %225 = vmatpush3.msra.mxu0 %v47_v28  ;;  %v109_v47 = vrot.slane %v101_v43, %v78_v29 }
   0xf   :  { %226 = vmatprep.subr.mxu0 %v250_v0  ;;  %v116_v48 = vrot.slane %v102_v44, %v78_v29 }
  0x10   :  { %227 = vmatpush3.msra.mxu0 %v46_v30 }
  0x11   :  { %228 = vmatprep.subr.mxu0 %v250_v0  ;;  %v117_v51 = vcombine.low %v109_v47, %v116_v48 }
  0x12   :  { %229 = vmatpush3.msra.mxu0 %v45_v35 }
  0x13   :  { %230 = vmatprep.subr.mxu0 %v250_v0 }
  0x14   :  { %231 = vmatpush3.msra.mxu0 %v44_v36 }
  0x15   :  { %232 = vmatprep.subr.mxu0 %v250_v0 }
  0x16   :  { %233 = vmatpush3.msra.mxu0 %v43_v41 }
  0x17   :  { %234 = vmatprep.subr.mxu0 %v250_v0 }
  0x18   :  { %235 = vmatpush3.msra.mxu0 %v42_v42 }
  0x19   :  { %236 = vmatprep.subr.mxu0 %v250_v0 }
  0x1a   :  { %237 = vmatpush3.msra.mxu0 %v41_v45 }
  0x1b   :  { %238 = vmatprep.subr.mxu0 %v250_v0 }
  0x1c   :  { %239 = vmatpush3.msra.mxu0 %v40_v46 }
  0x1d   :  { %240 = vmatprep.subr.mxu0 %v250_v0 }
  0x1e   :  { %241 = vmatpush3.msra.mxu0 %v39_v49 }
  0x1f   :  { %242 = vmatprep.subr.mxu0 %v250_v0 }
  0x20   :  { %243 = vmatpush3.msra.mxu0 %v38_v50 }
  0x21   :  { %245 = vmatmul.mubr.f32.vlgmr.msra.gmra.mxu0 %v117_v51 }
  0xe1   :  { %v185_v53 = vpop.f32.mrf.mxu0 }
  0xe2   :  { %v186_v54 = vadd.f32 %v194_v52, %v185_v53 }
  0xe3   :  { %v246_v55 = vpop.f32.mrf.mxu0 }
  0xe4   :  { %189 = vst [vmem:[%s371_s3] sm:$0xff] %v186_v54 }

// kernel: base_model_forward.2
= control target key start
LH: loop header
LB: loop body
LE: loop exit
PB: predicated region body
PF: predicated region fallthrough
CT: control target
= control target key end

     0   :  { %s3802_s12 = smov 0   ;;  %s5226_s0 = inlined_call_operand.vmem [shape: bf16[2,18,18,4], index: 0, kind: input, shape index: {}]   ;;  %s5227_s1 = inlined_call_operand.vmem [shape: bf16[36,128], index: 1, kind: input, shape index: {}]   ;;  %s5228_s2 = inlined_call_operand.vmem [shape: f32[1,128], index: 2, kind: input, shape index: {}]   ;;  %s5229_s3 = inlined_call_operand.vmem [shape: f32[2,1,128], index: 3, kind: output, shape index: {}]  }
   0x1 LB: > { %s3043_s13 = sadd.s32 4294967295, %s3780_s12   ;;  %p3047_p0 = scmp.ge.s32.totalorder %s3780_s12, 1  ;;  %s3780_s12 = sphi %s3802_s12, %s13_s12  }
   0x2   : > { %p137_p1 = scmp.lt.s32.totalorder %s3780_s12, 3 }
   0x4   : > { %p138_p2 = pnand %p3047_p0, %p137_p1 }
   0x6   : > { %141 = sbr.rel (%p138_p2) target bundleno = 574 (0x23e), region = 32 }
   0xb   : > { %v222_v0 = vld [vmem:[%s5227_s1] sm:$0xf]  ;;  %p159_p3 = scmp.lt.s32.totalorder %s3043_s13, 1  ;;  %v223_v2 = vld [vmem:[%s5227_s1 + $0x4] sm:$0xf]  ;;  %vm715_vm0 = vcmask 1041408  }
   0xc   : > { %v3065_v1 = vcombine.low %v222_v0, %v222_v0  ;;  %v3163_v3 = vcombine.low %v223_v2, %v223_v2  ;;  %vm227_vm1 = vsmask.f32 3328  ;;  %vm228_vm2 = vsmask.f32 7440 }
   0xd   : > { %s5379_s13 = smov (!%p159_p3, %s3043_s13), 1  ;;  %v3828_v6 = vsel %vm715_vm0, %v222_v0, 0  ;;  %v3833_v8 = vsel %vm715_vm0, %v223_v2, 0  ;;  %vm666_vm3 = vcmask 31744   ;;  %vm3874_vm4 = vmor %vm227_vm1, %vm228_vm2  ;;  %v5273_v35 = vmov 0 }
   0xe   : > { %v665_v4 = vrot.slane %v3065_v1, 2  ;;  %s3743_s18 = smul.u32 216, %s5379_s13  ;;  %v3830_v7 = vrot.slane %v3163_v3, 2  ;;  %v5274_v35 = vsel %vm3874_vm4, 4294967295, %v5273_v35  ;;  %vm1188_vm5 = vcmask 1042432   ;;  %s166_s5 = scalar_lea.vmem %s5229_s3, %s5379_s13 }
   0xf   : > { %5275 = vst [vmem:[#allocation2_spill] sm:$0xff] %v5274_v35  ;;  %vm1189_vm6 = vcmask 1046532  }
  0x10   : > { %3734 = vmatprep.subr.msk.bf16.mxu1 %vm715_vm0, %v665_v4  ;;  %3733 = vmatprep.subr.msk.bf16.mxu0 %vm715_vm0, %v665_v4  ;;  %v717_v5 = vsel %vm715_vm0, %v665_v4, 0  ;;  %s3825_s21 = scalar_lea.vmem %s5226_s0, %s3743_s18  ;;  %vm4192_vm7 = vmor %vm1188_vm5, %vm1189_vm6 }
  0x11   : > { %3732 = vmatpush3.bf16.msra.mxu1 %v717_v5  ;;  %3426 = vmatpush3.bf16.msra.mxu0 %v717_v5  ;;  %v3836_v9 = vld [vmem:[%s3825_s21] sm:$0xf]  ;;  %v3839_v10 = vld [vmem:[%s3825_s21 + $0x4] sm:$0xf]  ;;  %v3842_v11 = vld [vmem:[%s3825_s21 + $0x8] sm:$0x1] }
  0x12   : > { %3735 = vmatprep.subr.msk.bf16.mxu1 %vm715_vm0, %v222_v0  ;;  %3736 = vmatprep.subr.msk.bf16.mxu0 %vm715_vm0, %v223_v2  ;;  %v231_v12 = vshrl.u32 %v3836_v9, 16  ;;  %v234_v13 = vshll.u32 %v3836_v9, 16  ;;  %v240_v14 = vshll.u32 %v3839_v10, 16  ;;  %v244_v15 = vshrl.u32 %v3839_v10, 16  ;;  %v3851_v16 = vld [vmem:[%s3825_s21 + $0x60] sm:$0xf] }
  0x13   : > { %v250_v17 = vshll.u32 %v3842_v11, 16  ;;  %v3856_v19 = vld [vmem:[%s3825_s21 + $0x64] sm:$0xf]  ;;  %v3859_v20 = vld [vmem:[%s3825_s21 + $0x68] sm:$0x1]  ;;  %v423_v26 = vshrl.u32 %v3851_v16, 16 }
  0x14   : > { %v233_v21 = vrot.slane %v231_v12, 4  ;;  %v236_v22 = vrot.slane %v234_v13, 5  ;;  %v242_v23 = vrot.slane %v240_v14, 5  ;;  %v246_v24 = vrot.slane %v244_v15, 4  ;;  %v3867_v33 = vld [vmem:[%s3825_s21 + $0xc] sm:$0xf] }
  0x15   : > { %v252_v25 = vrot.slane %v250_v17, 5  ;;  %v426_v27 = vshll.u32 %v3851_v16, 16  ;;  %v432_v28 = vshll.u32 %v3856_v19, 16  ;;  %v436_v31 = vshrl.u32 %v3856_v19, 16  ;;  %v3870_v34 = vld [vmem:[%s3825_s21 + $0x10] sm:$0xf] }
  0x16   : > { %v237_v29 = vor.u32 %v236_v22, %v233_v21  ;;  %v247_v30 = vor.u32 %v246_v24, %v242_v23  ;;  %v442_v32 = vshll.u32 %v3859_v20, 16  ;;  %v425_v36 = vrot.slane %v423_v26, 4  ;;  %v3881_v45 = vld [vmem:[%s3825_s21 + $0x14] sm:$0x1]  ;;  %v3892_v57 = vld [vmem:[%s3825_s21 + $0x6c] sm:$0xf] }
  0x17   : > { %v428_v37 = vrot.slane %v426_v27, 5  ;;  %v434_v38 = vrot.slane %v432_v28, 5  ;;  %v438_v42 = vrot.slane %v436_v31, 4  ;;  %v255_v46 = vshrl.u32 %v3867_v33, 16  ;;  %5276 = vst [vmem:[#allocation3_spill] sm:$0xff] %v3892_v57 }
  0x18   : > { %v238_v40 = vrot.slane %v237_v29, 4  ;;  %v248_v41 = vrot.slane %v247_v30, 4  ;;  %v444_v43 = vrot.slane %v442_v32, 5  ;;  %v258_v47 = vshll.u32 %v3867_v33, 16  ;;  %v3896_v62 = vld [vmem:[%s3825_s21 + $0x70] sm:$0xf] }
  0x19   : > { %v429_v44 = vor.u32 %v428_v37, %v425_v36  ;;  %v264_v48 = vshll.u32 %v3870_v34, 16  ;;  %v439_v51 = vor.u32 %v438_v42, %v434_v38  ;;  %v268_v52 = vshrl.u32 %v3870_v34, 16  ;;  %v3904_v3 = vld [vmem:[%s3825_s21 + $0x74] sm:$0x1]  ;;  %v3910_v14 = vld [vmem:[%s3825_s21 + $0x18] sm:$0xf] }
  0x1a   : > { %v243_v49 = vsel %vm3874_vm4, %v238_v40, %v242_v23  ;;  %v253_v50 = vsel %vm3874_vm4, %v248_v41, %v252_v25  ;;  %v257_v55 = vrot.slane %v255_v46, 4  ;;  %v260_v56 = vrot.slane %v258_v47, 5  ;;  %5277 = vst [vmem:[#allocation4_spill] sm:$0xff] %v3904_v3  ;;  %v3919_v27 = vld [vmem:[%s3825_s21 + $0x1c] sm:$0xf] }
  0x1b   : > { %v3049_v53 = vcombine.low %v243_v49, %v253_v50  ;;  %v430_v54 = vrot.slane %v429_v44, 4  ;;  %v440_v58 = vrot.slane %v439_v51, 4  ;;  %v266_v59 = vrot.slane %v264_v48, 5  ;;  %v3926_v31 = vld [vmem:[%s3825_s21 + $0x20] sm:$0x1] }
  0x1c   : > { %v270_v60 = vrot.slane %v268_v52, 4  ;;  %v274_v61 = vshll.u32 %v3881_v45, 16  ;;  %v261_v0 = vor.u32 %v260_v56, %v257_v55  ;;  %v447_v13 = vshrl.u32 %v3892_v57, 16  ;;  %v3933_v41 = vld [vmem:[%s3825_s21 + $0x78] sm:$0xf] }
  0x1d   : > { %3427 = vmatprep.mubr.msk.bf16.mxu0 %vm666_vm3, %v3049_v53  ;;  %v435_v63 = vsel %vm3874_vm4, %v430_v54, %v434_v38  ;;  %v445_v4 = vsel %vm3874_vm4, %v440_v58, %v444_v43  ;;  %v450_v21 = vshll.u32 %v3892_v57, 16  ;;  %v456_v22 = vshll.u32 %v3896_v62, 16  ;;  %5279 = vst [vmem:[#allocation6_spill] sm:$0xff] %v3933_v41  ;;  %v3941_v47 = vld [vmem:[%s5227_s1 + $0x8] sm:$0xf] }
  0x1e   : > { %v271_v5 = vor.u32 %v270_v60, %v266_v59  ;;  %v276_v12 = vrot.slane %v274_v61, 5  ;;  %v3912_v15 = vcombine.low %v435_v63, %v445_v4  ;;  %v262_v17 = vrot.slane %v261_v0, 4  ;;  %v3946_v52 = vld [vmem:[%s3825_s21 + $0x7c] sm:$0xf]  ;;  %v3954_v63 = vld [vmem:[%s3825_s21 + $0x80] sm:$0x1] }
  0x1f   : > { %v449_v24 = vrot.slane %v447_v13, 4  ;;  %v460_v25 = vshrl.u32 %v3896_v62, 16  ;;  %v466_v26 = vshll.u32 %v3904_v3, 16  ;;  %v452_v29 = vrot.slane %v450_v21, 5  ;;  %5281 = vst [vmem:[#allocation8_spill] sm:$0xff] %v3946_v52  ;;  %5282 = vst [vmem:[#allocation9_spill] sm:$0xff] %v3954_v63 }
  0x20   : > { %5278 = vst [vmem:[#allocation5_spill] sm:$0xff] %v3912_v15  ;;  %v272_v23 = vrot.slane %v271_v5, 4  ;;  %3443 = vmatprep.mubr.msk.bf16.mxu1 %vm666_vm3, %v3912_v15  ;;  %v267_v28 = vsel %vm3874_vm4, %v262_v17, %v266_v59  ;;  %v458_v30 = vrot.slane %v456_v22, 5  ;;  %v279_v32 = vshrl.u32 %v3910_v14, 16  ;;  %v3960_v13 = vld [vmem:[%s3825_s21 + $0x24] sm:$0xf] }
  0x21   : > { %v462_v37 = vrot.slane %v460_v25, 4  ;;  %v468_v38 = vrot.slane %v466_v26, 5  ;;  %v282_v40 = vshll.u32 %v3910_v14, 16  ;;  %v453_v43 = vor.u32 %v452_v29, %v449_v24 }
  0x22   : > { %v277_v36 = vsel %vm3874_vm4, %v272_v23, %v276_v12  ;;  %v281_v44 = vrot.slane %v279_v32, 4  ;;  %v288_v46 = vshll.u32 %v3919_v27, 16  ;;  %v292_v50 = vshrl.u32 %v3919_v27, 16  ;;  %v3968_v23 = vld [vmem:[%s3825_s21 + $0x28] sm:$0xf] }
  0x23   : > { %v3935_v42 = vcombine.low %v267_v28, %v277_v36  ;;  %v463_v48 = vor.u32 %v462_v37, %v458_v30  ;;  %v284_v49 = vrot.slane %v282_v40, 5  ;;  %v298_v51 = vshll.u32 %v3926_v31, 16  ;;  %v3976_v36 = vld [vmem:[%s3825_s21 + $0x2c] sm:$0x1] }
  0x24   : > { %v454_v53 = vrot.slane %v453_v43, 4  ;;  %v290_v54 = vrot.slane %v288_v46, 5  ;;  %v471_v55 = vshrl.u32 %v3933_v41, 16  ;;  %v474_v56 = vshll.u32 %v3933_v41, 16  ;;  %v3984_v46 = vld [vmem:[%s3825_s21 + $0x84] sm:$0xf] }
  0x25   : > { %5280 = vst [vmem:[#allocation7_spill] sm:$0xff] %v3935_v42  ;;  %3428 = vmatmul.mubr.msk.bf16.vlgmr.msra.gmra.mxu0 %vm666_vm3, %v3935_v42  ;;  %v464_v58 = vrot.slane %v463_v48, 4  ;;  %v285_v59 = vor.u32 %v284_v49, %v281_v44  ;;  %v294_v60 = vrot.slane %v292_v50, 4  ;;  %v300_v61 = vrot.slane %v298_v51, 5  ;;  %v4131_v42 = vld [vmem:[%s3825_s21 + $0xb0] sm:$0x1] }
  0x26   : > { %3494 = vmatpush3.bf16.msra.mxu0 %v3833_v8  ;;  %v459_v0 = vsel %vm3874_vm4, %v454_v53, %v458_v30  ;;  %v473_v4 = vrot.slane %v471_v55, 4  ;;  %v476_v5 = vrot.slane %v474_v56, 5  ;;  %v480_v12 = vshll.u32 %v3946_v52, 16  ;;  %v3991_v53 = vld [vmem:[%s3825_s21 + $0x88] sm:$0xf]  ;;  %5294 = vst [vmem:[#allocation21_spill] sm:$0xff] %v4131_v42 }
  0x27   : > { %3738 = vmatprep.subr.msk.bf16.mxu0 %vm715_vm0, %v3941_v47  ;;  %v469_v8 = vsel %vm3874_vm4, %v464_v58, %v468_v38  ;;  %v286_v17 = vrot.slane %v285_v59, 4  ;;  %v295_v21 = vor.u32 %v294_v60, %v290_v54  ;;  %v484_v22 = vshrl.u32 %v3946_v52, 16  ;;  %v4153_v52 = vld [vmem:[%s3825_s21 + $0x5c] sm:$0x1] }
  0x28   : > { %v3970_v24 = vcombine.low %v459_v0, %v469_v8  ;;  %v477_v25 = vor.u32 %v476_v5, %v473_v4  ;;  %v482_v26 = vrot.slane %v480_v12, 5  ;;  %v490_v28 = vshll.u32 %v3954_v63, 16 }
  0x29   : > { %v291_v29 = vsel %vm3874_vm4, %v286_v17, %v290_v54  ;;  %v296_v30 = vrot.slane %v295_v21, 4  ;;  %v486_v32 = vrot.slane %v484_v22, 4  ;;  %v303_v37 = vshrl.u32 %v3960_v13, 16  ;;  %v4010_v17 = vld [vmem:[%s3825_s21 + $0x30] sm:$0xf] }
  0x2a   : > { %5283 = vst [vmem:[#allocation10_spill] sm:$0xff] %v3970_v24  ;;  %3444 = vmatmul.mubr.msk.bf16.vlgmr.msra.gmra.mxu1 %vm666_vm3, %v3970_v24  ;;  %v478_v38 = vrot.slane %v477_v25, 4  ;;  %v492_v40 = vrot.slane %v490_v28, 5  ;;  %v306_v43 = vshll.u32 %v3960_v13, 16  ;;  %v312_v44 = vshll.u32 %v3968_v23, 16 }
  0x2b   : > { %3460 = vmatpush3.bf16.msra.mxu1 %v3828_v6  ;;  %v301_v48 = vsel %vm3874_vm4, %v296_v30, %v300_v61  ;;  %v487_v49 = vor.u32 %v486_v32, %v482_v26  ;;  %v305_v50 = vrot.slane %v303_v37, 4  ;;  %v316_v51 = vshrl.u32 %v3968_v23, 16  ;;  %v4001_v61 = vld [vmem:[%s3825_s21 + $0x8c] sm:$0x1]  ;;  %v4015_v28 = vld [vmem:[%s3825_s21 + $0x34] sm:$0xf] }
  0x2c   : > { %v3993_v54 = vcombine.low %v291_v29, %v301_v48  ;;  %v483_v55 = vsel %vm3874_vm4, %v478_v38, %v482_v26  ;;  %v308_v56 = vrot.slane %v306_v43, 5  ;;  %v314_v58 = vrot.slane %v312_v44, 5  ;;  %3737 = vmatprep.subr.msk.bf16.mxu1 %vm715_vm0, %v3830_v7 }
  0x2d   : > { %v488_v6 = vrot.slane %v487_v49, 4  ;;  %v318_v59 = vrot.slane %v316_v51, 4  ;;  %v322_v60 = vshll.u32 %v3976_v36, 16  ;;  %v495_v0 = vshrl.u32 %v3984_v46, 16 }
  0x2e   : > { %5284 = vst [vmem:[#allocation11_spill] sm:$0xff] %v3993_v54  ;;  %3431 = vmatprep.mubr.msk.bf16.mxu0 %vm666_vm3, %v3993_v54  ;;  %v309_v4 = vor.u32 %v308_v56, %v305_v50  ;;  %v498_v5 = vshll.u32 %v3984_v46, 16  ;;  %v504_v12 = vshll.u32 %v3991_v53, 16  ;;  %v508_v8 = vshrl.u32 %v3991_v53, 16  ;;  %v4026_v50 = vld [vmem:[%s3825_s21 + $0x38] sm:$0x1] }
  0x2f   : > { %v493_v21 = vsel %vm3874_vm4, %v488_v6, %v492_v40  ;;  %v319_v22 = vor.u32 %v318_v59, %v314_v58  ;;  %v324_v25 = vrot.slane %v322_v60, 5  ;;  %v497_v26 = vrot.slane %v495_v0, 4  ;;  %v4031_v56 = vld [vmem:[%s3825_s21 + $0x90] sm:$0xf] }
  0x30   : > { %v4017_v29 = vcombine.low %v483_v55, %v493_v21  ;;  %v310_v30 = vrot.slane %v309_v4, 4  ;;  %v500_v32 = vrot.slane %v498_v5, 5  ;;  %v506_v37 = vrot.slane %v504_v12, 5  ;;  %v4036_v4 = vld [vmem:[%s3825_s21 + $0x94] sm:$0xf] }
  0x31   : > { %v320_v38 = vrot.slane %v319_v22, 4  ;;  %v510_v43 = vrot.slane %v508_v8, 4  ;;  %v514_v44 = vshll.u32 %v4001_v61, 16  ;;  %v327_v48 = vshrl.u32 %v4010_v17, 16 }
  0x32   : > { %5285 = vst [vmem:[#allocation12_spill] sm:$0xff] %v4017_v29  ;;  %3447 = vmatprep.mubr.msk.bf16.mxu1 %vm666_vm3, %v4017_v29  ;;  %v315_v40 = vsel %vm3874_vm4, %v310_v30, %v314_v58  ;;  %v501_v49 = vor.u32 %v500_v32, %v497_v26  ;;  %v330_v51 = vshll.u32 %v4010_v17, 16  ;;  %v336_v55 = vshll.u32 %v4015_v28, 16  ;;  %v4082_v29 = vld [vmem:[%s3825_s21 + $0xa0] sm:$0xf] }
  0x33   : > { %v325_v6 = vsel %vm3874_vm4, %v320_v38, %v324_v25  ;;  %v511_v59 = vor.u32 %v510_v43, %v506_v37  ;;  %v516_v60 = vrot.slane %v514_v44, 5  ;;  %v329_v0 = vrot.slane %v327_v48, 4  ;;  %v4048_v38 = vld [vmem:[%s3825_s21 + $0x98] sm:$0x1]  ;;  %v4053_v48 = vld [vmem:[%s3825_s21 + $0x3c] sm:$0xf] }
  0x34   : > { %v4038_v58 = vcombine.low %v315_v40, %v325_v6  ;;  %v502_v5 = vrot.slane %v501_v49, 4  ;;  %v332_v12 = vrot.slane %v330_v51, 5  ;;  %v338_v8 = vrot.slane %v336_v55, 5  ;;  %v4058_v6 = vld [vmem:[%s3825_s21 + $0x40] sm:$0xf] }
  0x35   : > { %v512_v21 = vrot.slane %v511_v59, 4  ;;  %v340_v22 = vshrl.u32 %v4015_v28, 16  ;;  %v346_v26 = vshll.u32 %v4026_v50, 16  ;;  %v519_v25 = vshrl.u32 %v4031_v56, 16 }
  0x36   : > { %5286 = vst [vmem:[#allocation13_spill] sm:$0xff] %v4038_v58  ;;  %3432 = vmatmul.mubr.msk.bf16.gmra.mxu0 %vm666_vm3, %v4038_v58  ;;  %v507_v30 = vsel %vm3874_vm4, %v502_v5, %v506_v37  ;;  %v333_v32 = vor.u32 %v332_v12, %v329_v0  ;;  %v522_v43 = vshll.u32 %v4031_v56, 16  ;;  %v528_v44 = vshll.u32 %v4036_v4, 16 }
  0x37   : > { %v517_v40 = vsel %vm3874_vm4, %v512_v21, %v516_v60  ;;  %v342_v49 = vrot.slane %v340_v22, 4  ;;  %v348_v51 = vrot.slane %v346_v26, 5  ;;  %v521_v55 = vrot.slane %v519_v25, 4  ;;  %v4070_v22 = vld [vmem:[%s3825_s21 + $0x44] sm:$0x1] }
  0x38   : > { %v4060_v37 = vcombine.low %v507_v30, %v517_v40  ;;  %v334_v59 = vrot.slane %v333_v32, 4  ;;  %v524_v0 = vrot.slane %v522_v43, 5  ;;  %v530_v5 = vrot.slane %v528_v44, 5  ;;  %v4075_v30 = vld [vmem:[%s3825_s21 + $0x9c] sm:$0xf] }
  0x39   : > { %v343_v12 = vor.u32 %v342_v49, %v338_v8  ;;  %v532_v39 = vshrl.u32 %v4036_v4, 16  ;;  %v538_v2 = vshll.u32 %v4048_v38, 16  ;;  %v351_v18 = vshrl.u32 %v4053_v48, 16 }
  0x3a   : > { %5287 = vst [vmem:[#allocation14_spill] sm:$0xff] %v4060_v37  ;;  %3448 = vmatmul.mubr.msk.bf16.gmra.mxu1 %vm666_vm3, %v4060_v37  ;;  %v339_v60 = vsel %vm3874_vm4, %v334_v59, %v338_v8  ;;  %v525_v21 = vor.u32 %v524_v0, %v521_v55  ;;  %v354_v26 = vshll.u32 %v4053_v48, 16  ;;  %v360_v25 = vshll.u32 %v4058_v6, 16 }
  0x3b   : > { %v344_v32 = vrot.slane %v343_v12, 4  ;;  %v534_v43 = vrot.slane %v532_v39, 4  ;;  %v540_v44 = vrot.slane %v538_v2, 5  ;;  %v353_v40 = vrot.slane %v351_v18, 4 }
  0x3c   : > { %v526_v49 = vrot.slane %v525_v21, 4  ;;  %v356_v1 = vrot.slane %v354_v26, 5  ;;  %v362_v37 = vrot.slane %v360_v25, 5  ;;  %v364_v8 = vshrl.u32 %v4058_v6, 16  ;;  %v4090_v26 = vld [vmem:[%s3825_s21 + $0xa4] sm:$0x1] }
  0x3d   : > { %v349_v55 = vsel %vm3874_vm4, %v344_v32, %v348_v51  ;;  %v535_v59 = vor.u32 %v534_v43, %v530_v5  ;;  %v370_v0 = vshll.u32 %v4070_v22, 16  ;;  %v543_v12 = vshrl.u32 %v4075_v30, 16  ;;  %5289 = vst [vmem:[#allocation16_spill] sm:$0xff] %v4090_v26  ;;  %v4093_v25 = vld [vmem:[%s3825_s21 + $0x48] sm:$0xf] }
  0x3e   : > { %v4085_v39 = vcombine.low %v339_v60, %v349_v55  ;;  %v531_v18 = vsel %vm3874_vm4, %v526_v49, %v530_v5  ;;  %v357_v2 = vor.u32 %v356_v1, %v353_v40  ;;  %v366_v21 = vrot.slane %v364_v8, 4 }
  0x3f   : > { %v536_v51 = vrot.slane %v535_v59, 4  ;;  %v372_v32 = vrot.slane %v370_v0, 5  ;;  %v545_v43 = vrot.slane %v543_v12, 4  ;;  %v546_v24 = vshll.u32 %v4075_v30, 16  ;;  %v4104_v59 = vld [vmem:[%s3825_s21 + $0x4c] sm:$0xf] }
  0x40   : > { %5288 = vst [vmem:[#allocation15_spill] sm:$0xff] %v4085_v39  ;;  %3435 = vmatprep.mubr.msk.bf16.mxu0 %vm666_vm3, %v4085_v39  ;;  %v358_v60 = vrot.slane %v357_v2, 4  ;;  %v367_v55 = vor.u32 %v366_v21, %v362_v37  ;;  %v552_v5 = vshll.u32 %v4082_v29, 16  ;;  %v556_v1 = vshrl.u32 %v4082_v29, 16  ;;  %v4112_v39 = vld [vmem:[%s3825_s21 + $0x50] sm:$0x1] }
  0x41   : > { %v541_v40 = vsel %vm3874_vm4, %v536_v51, %v540_v44  ;;  %v548_v49 = vrot.slane %v546_v24, 5  ;;  %v562_v8 = vshll.u32 %v4090_v26, 16  ;;  %v375_v0 = vshrl.u32 %v4093_v25, 16  ;;  %v4115_v51 = vld [vmem:[%s3825_s21 + $0xa8] sm:$0xf] }
  0x42   : > { %v4107_v12 = vcombine.low %v531_v18, %v541_v40  ;;  %v363_v2 = vsel %vm3874_vm4, %v358_v60, %v362_v37  ;;  %v368_v21 = vrot.slane %v367_v55, 4  ;;  %v554_v15 = vrot.slane %v552_v5, 5  ;;  %5291 = vst [vmem:[#allocation18_spill] sm:$0xff] %v4115_v51 }
  0x43   : > { %v549_v58 = vor.u32 %v548_v49, %v545_v43  ;;  %v558_v54 = vrot.slane %v556_v1, 4  ;;  %v564_v44 = vrot.slane %v562_v8, 5  ;;  %v377_v24 = vrot.slane %v375_v0, 4  ;;  %v4128_v49 = vld [vmem:[%s3825_s21 + $0xac] sm:$0xf] }
  0x44   : > { %5290 = vst [vmem:[#allocation17_spill] sm:$0xff] %v4107_v12  ;;  %3451 = vmatprep.mubr.msk.bf16.mxu1 %vm666_vm3, %v4107_v12  ;;  %v373_v18 = vsel %vm3874_vm4, %v368_v21, %v372_v32  ;;  %v378_v37 = vshll.u32 %v4093_v25, 16  ;;  %v384_v60 = vshll.u32 %v4104_v59, 16  ;;  %v388_v55 = vshrl.u32 %v4104_v59, 16  ;;  %5293 = vst [vmem:[#allocation20_spill] sm:$0xff] %v4128_v49 }
  0x45   : > { %v4124_v5 = vcombine.low %v363_v2, %v373_v18  ;;  %v550_v43 = vrot.slane %v549_v58, 4  ;;  %v559_v1 = vor.u32 %v558_v54, %v554_v15  ;;  %v394_v40 = vshll.u32 %v4112_v39, 16 }
  0x46   : > { %v380_v8 = vrot.slane %v378_v37, 5  ;;  %v386_v0 = vrot.slane %v384_v60, 5  ;;  %v390_v12 = vrot.slane %v388_v55, 4  ;;  %v567_v32 = vshrl.u32 %v4115_v51, 16  ;;  %v4141_v55 = vld [vmem:[%s3825_s21 + $0x54] sm:$0xf] }
  0x47   : > { %5292 = vst [vmem:[#allocation19_spill] sm:$0xff] %v4124_v5  ;;  %3436 = vmatmul.mubr.msk.bf16.gmra.mxu0 %vm666_vm3, %v4124_v5  ;;  %v555_v58 = vsel %vm3874_vm4, %v550_v43, %v554_v15  ;;  %v560_v54 = vrot.slane %v559_v1, 4  ;;  %v396_v2 = vrot.slane %v394_v40, 5  ;;  %v570_v21 = vshll.u32 %v4115_v51, 16  ;;  %v4148_v1 = vld [vmem:[%s3825_s21 + $0x58] sm:$0xf] }
  0x48   : > { %v381_v18 = vor.u32 %v380_v8, %v377_v24  ;;  %v391_v63 = vor.u32 %v390_v12, %v386_v0  ;;  %v569_v37 = vrot.slane %v567_v32, 4  ;;  %v576_v60 = vshll.u32 %v4128_v49, 16 }
  0x49   : > { %v565_v5 = vsel %vm3874_vm4, %v560_v54, %v564_v44  ;;  %v572_v41 = vrot.slane %v570_v21, 5  ;;  %v580_v15 = vshrl.u32 %v4128_v49, 16  ;;  %v586_v43 = vshll.u32 %v4131_v42, 16 }
  0x4a   : > { %v4150_v12 = vcombine.low %v555_v58, %v565_v5  ;;  %v382_v24 = vrot.slane %v381_v18, 4  ;;  %v392_v40 = vrot.slane %v391_v63, 4  ;;  %v578_v8 = vrot.slane %v576_v60, 5 }
  0x4b   : > { %v573_v32 = vor.u32 %v572_v41, %v569_v37  ;;  %v582_v3 = vrot.slane %v580_v15, 4  ;;  %v588_v57 = vrot.slane %v586_v43, 5  ;;  %v399_v44 = vshrl.u32 %v4141_v55, 16  ;;  %v4165_v41 = vld [vmem:[%s3825_s21 + $0xb4] sm:$0xf] }
  0x4c   : > { %5295 = vst [vmem:[#allocation22_spill] sm:$0xff] %v4150_v12  ;;  %3452 = vmatmul.mubr.msk.bf16.gmra.mxu1 %vm666_vm3, %v4150_v12  ;;  %v387_v54 = vsel %vm3874_vm4, %v382_v24, %v386_v0  ;;  %v397_v5 = vsel %vm3874_vm4, %v392_v40, %v396_v2  ;;  %v402_v63 = vshll.u32 %v4141_v55, 16  ;;  %v408_v58 = vshll.u32 %v4148_v1, 16  ;;  %5296 = vst [vmem:[#allocation23_spill] sm:$0xff] %v4165_v41  ;;  %v4170_v15 = vld [vmem:[%s3825_s21 + $0xb8] sm:$0xf] }
  0x4d   : > { %v4167_v21 = vcombine.low %v387_v54, %v397_v5  ;;  %v574_v18 = vrot.slane %v573_v32, 4  ;;  %v583_v37 = vor.u32 %v582_v3, %v578_v8  ;;  %v401_v60 = vrot.slane %v399_v44, 4 }
  0x4e   : > { %v404_v43 = vrot.slane %v402_v63, 5  ;;  %v410_v12 = vrot.slane %v408_v58, 5  ;;  %v412_v0 = vshrl.u32 %v4148_v1, 16  ;;  %v418_v2 = vshll.u32 %v4153_v52, 16  ;;  %v4181_v63 = vld [vmem:[%s3825_s21 + $0xbc] sm:$0x1] }
  0x4f   : > { %5297 = vst [vmem:[#allocation24_spill] sm:$0xff] %v4167_v21  ;;  %3439 = vmatprep.mubr.msk.bf16.mxu0 %vm666_vm3, %v4167_v21  ;;  %v579_v24 = vsel %vm3874_vm4, %v574_v18, %v578_v8  ;;  %v584_v40 = vrot.slane %v583_v37, 4  ;;  %v591_v32 = vshrl.u32 %v4165_v41, 16  ;;  %v594_v3 = vshll.u32 %v4165_v41, 16 }
  0x50   : > { %v405_v44 = vor.u32 %v404_v43, %v401_v60  ;;  %v414_v54 = vrot.slane %v412_v0, 4  ;;  %v420_v5 = vrot.slane %v418_v2, 5  ;;  %v600_v58 = vshll.u32 %v4170_v15, 16 }
  0x51   : > { %v589_v42 = vsel %vm3874_vm4, %v584_v40, %v588_v57  ;;  %v593_v51 = vrot.slane %v591_v32, 4  ;;  %v596_v21 = vrot.slane %v594_v3, 5  ;;  %v604_v49 = vshrl.u32 %v4170_v15, 16 }
  0x52   : > { %v4187_v8 = vcombine.low %v579_v24, %v589_v42  ;;  %v406_v18 = vrot.slane %v405_v44, 4  ;;  %v415_v37 = vor.u32 %v414_v54, %v410_v12  ;;  %v602_v26 = vrot.slane %v600_v58, 5 }
  0x53   : > { %v597_v41 = vor.u32 %v596_v21, %v593_v51  ;;  %v606_v60 = vrot.slane %v604_v49, 4  ;;  %v610_v43 = vshll.u32 %v4181_v63, 16  ;;  %v3114_v57 = vrot.slane %v3836_v9, 9 }
  0x54   : > { %3455 = vmatprep.mubr.msk.bf16.mxu1 %vm666_vm3, %v4187_v8  ;;  %v411_v42 = vsel %vm3874_vm4, %v406_v18, %v410_v12  ;;  %v416_v2 = vrot.slane %v415_v37, 4  ;;  %v1193_v51 = vrot.slane %v3839_v10, 5  ;;  %v4204_v49 = vcombine.low %v3867_v33, %v3870_v34 }
  0x55   : > { %v598_v21 = vrot.slane %v597_v41, 4  ;;  %v607_v24 = vor.u32 %v606_v60, %v602_v26  ;;  %v612_v40 = vrot.slane %v610_v43, 5  ;;  %v3115_v32 = vrot.slane %v3867_v33, 9 }
  0x56   : > { %v421_v3 = vsel %vm3874_vm4, %v416_v2, %v420_v5  ;;  %v1194_v44 = vsel %vm4192_vm7, %v3114_v57, %v1193_v51  ;;  %v1195_v54 = vrot.slane %v1193_v51, 4  ;;  %v5300_v12 = vrot.slane %v3870_v34, 5 }
  0x57   : > { %v4213_v18 = vcombine.low %v411_v42, %v421_v3  ;;  %v603_v37 = vsel %vm3874_vm4, %v598_v21, %v602_v26  ;;  %v608_v41 = vrot.slane %v607_v24, 4  ;;  %v5302_v5 = vrot.slane %v3842_v11, 5 }
  0x58   : > { %v1202_v58 = vrot.slane %v5300_v12, 4  ;;  %v5301_v60 = vmov %v5300_v12  ;;  %v5303_v57 = vrot.slane %v3881_v45, 5  ;;  %v4231_v2 = vcombine.low %v3910_v14, %v3919_v27 }
  0x59   : > { %v1201_v33 = vsel %vm4192_vm7, %v3115_v32, %v5301_v60  ;;  %v1197_v43 = vsel %vm4192_vm7, %v1195_v54, %v5302_v5  ;;  %v3116_v26 = vrot.slane %v3910_v14, 9  ;;  %3440 = vmatmul.mubr.msk.bf16.gmra.mxu0 %vm666_vm3, %v4213_v18  ;;  %v613_v11 = vsel %vm3874_vm4, %v608_v41, %v612_v40 }
  0x5a   : > { %v1204_v42 = vsel %vm4192_vm7, %v1202_v58, %v5303_v57  ;;  %v3130_v34 = vcombine.low %v1194_v44, %v1197_v43  ;;  %v1207_v45 = vrot.slane %v3919_v27, 5  ;;  %v4241_v21 = vcombine.low %v603_v37, %v613_v11 }
  0x5b   : > { %v4238_v51 = vcombine.low %v1201_v33, %v1204_v42  ;;  %v1210_v24 = vrot.slane %v3926_v31, 5  ;;  %v3199_v14 = vcombine.low %v3941_v47, %v3941_v47  ;;  %v1214_v40 = vrot.slane %v3968_v23, 5  ;;  %v4280_v42 = vld [vmem:[%s5227_s1 + $0xc] sm:$0xf] }
  0x5c   : > { %5304 = vst [vmem:[#allocation25_spill] sm:$0xff] %v4241_v21  ;;  %3495 = vmatprep.mubr.msk.bf16.mxu0 %vm666_vm3, %v3130_v34  ;;  %v1208_v32 = vsel %vm4192_vm7, %v3116_v26, %v1207_v45  ;;  %v1209_v3 = vrot.slane %v1207_v45, 4  ;;  %3456 = vmatmul.mubr.msk.bf16.gmra.mxu1 %vm666_vm3, %v4241_v21  ;;  %v3117_v27 = vrot.slane %v3960_v13, 9  ;;  %v3118_v44 = vrot.slane %v4010_v17, 9 }
  0x5d   : > { %v1221_v31 = vrot.slane %v4015_v28, 5  ;;  %v5305_v54 = vcombine.low %v3836_v9, %v3839_v10  ;;  %v1216_v58 = vrot.slane %v1214_v40, 4  ;;  %v1217_v37 = vrot.slane %v3976_v36, 5 }
  0x5e   : > { %v1211_v12 = vsel %vm4192_vm7, %v1209_v3, %v1210_v24  ;;  %v1224_v41 = vrot.slane %v4026_v50, 5  ;;  %v4265_v5 = vrot.slane %v3199_v14, 2  ;;  %v1834_v43 = vsel %vm715_vm0, %v3941_v47, 0 }
  0x5f   : > { %3461 = vmatprep.mubr.msk.bf16.mxu1 %vm666_vm3, %v5305_v54  ;;  %v4263_v60 = vcombine.low %v1208_v32, %v1211_v12  ;;  %v1223_v33 = vrot.slane %v1221_v31, 4  ;;  %v1228_v9 = vrot.slane %v4058_v6, 5  ;;  %v1608_v10 = vsel %vm715_vm0, %v3830_v7, 0 }
  0x60   : > { %v1215_v57 = vsel %vm4192_vm7, %v3117_v27, %v1214_v40  ;;  %v1222_v36 = vsel %vm4192_vm7, %v3118_v44, %v1221_v31  ;;  %v1235_v50 = vrot.slane %v4104_v59, 5  ;;  %v1218_v47 = vsel %vm4192_vm7, %v1216_v58, %v1217_v37 }
  0x61   : > { %3496 = vmatmul.mubr.msk.bf16.vlgmr.msra.gmra.mxu0 %vm666_vm3, %v4238_v51  ;;  %v1225_v7 = vsel %vm4192_vm7, %v1223_v33, %v1224_v41  ;;  %v3119_v26 = vrot.slane %v4053_v48, 9  ;;  %v1231_v11 = vrot.slane %v4070_v22, 5  ;;  %v1230_v34 = vrot.slane %v1228_v9, 4 }
  0x62   : > { %3562 = vmatpush3.bf16.msra.mxu0 %v1834_v43  ;;  %3499 = vmatprep.mubr.msk.bf16.mxu0 %vm666_vm3, %v4263_v60  ;;  %v3120_v45 = vrot.slane %v4093_v25, 9  ;;  %v1237_v24 = vrot.slane %v1235_v50, 4  ;;  %v1238_v14 = vrot.slane %v4112_v39, 5  ;;  %v4300_v22 = vcombine.low %v1215_v57, %v1218_v47 }
  0x63   : > { %3740 = vmatprep.subr.msk.bf16.mxu0 %vm715_vm0, %v4280_v42  ;;  %v4302_v32 = vcombine.low %v1222_v36, %v1225_v7  ;;  %v1229_v3 = vsel %vm4192_vm7, %v3119_v26, %v1228_v9  ;;  %v1232_v39 = vsel %vm4192_vm7, %v1230_v34, %v1231_v11  ;;  %v1242_v44 = vrot.slane %v4148_v1, 5 }
  0x64   : > { %3462 = vmatmul.mubr.msk.bf16.vlgmr.msra.gmra.mxu1 %vm666_vm3, %v4204_v49  ;;  %v1236_v40 = vsel %vm4192_vm7, %v3120_v45, %v1235_v50  ;;  %v1239_v27 = vsel %vm4192_vm7, %v1237_v24, %v1238_v14  ;;  %v1252_v31 = vrot.slane %v3859_v20, 5  ;;  %v3121_v54 = vrot.slane %v4141_v55, 9  ;;  %v5306_v45 = vld [vmem:[#allocation16_spill] sm:$0xff] }
  0x65   : > { %3528 = vmatpush3.bf16.msra.mxu1 %v1608_v10  ;;  %3465 = vmatprep.mubr.msk.bf16.mxu1 %vm666_vm3, %v4231_v2  ;;  %v3122_v12 = vrot.slane %v3851_v16, 9  ;;  %v1249_v58 = vrot.slane %v3856_v19, 5  ;;  %v4321_v37 = vcombine.low %v3960_v13, %v3968_v23  ;;  %v4325_v41 = vcombine.low %v4010_v17, %v4015_v28  ;;  %v5307_v14 = vld [vmem:[#allocation20_spill] sm:$0xff] }
  0x66   : > { %3739 = vmatprep.subr.msk.bf16.mxu1 %vm715_vm0, %v4265_v5  ;;  %v4329_v33 = vcombine.low %v4053_v48, %v4058_v6  ;;  %v4333_v20 = vcombine.low %v4093_v25, %v4104_v59  ;;  %v4337_v43 = vcombine.low %v1229_v3, %v1232_v39  ;;  %v4339_v9 = vcombine.low %v1236_v40, %v1239_v27  ;;  %v5308_v3 = vld [vmem:[#allocation18_spill] sm:$0xff] }
  0x67   : > { %v1245_v13 = vrot.slane %v4153_v52, 5  ;;  %v4344_v23 = vcombine.low %v3984_v46, %v3991_v53  ;;  %v1244_v17 = vrot.slane %v1242_v44, 4  ;;  %v3125_v28 = vrot.slane %v3984_v46, 9 }
  0x68   : > { %v1270_v48 = vrot.slane %v3991_v53, 5  ;;  %v1273_v6 = vrot.slane %v4001_v61, 5  ;;  %v1243_v25 = vsel %vm4192_vm7, %v3121_v54, %v1242_v44  ;;  %v1250_v52 = vsel %vm4192_vm7, %v3122_v12, %v1249_v58  ;;  %v5309_v44 = vld [vmem:[#allocation21_spill] sm:$0xff] }
  0x69   : > { %3500 = vmatmul.mubr.msk.bf16.gmra.mxu0 %vm666_vm3, %v4300_v22  ;;  %v1251_v59 = vrot.slane %v1249_v58, 4  ;;  %v4357_v10 = vcombine.low %v4031_v56, %v4036_v4  ;;  %v3126_v61 = vrot.slane %v4031_v56, 9  ;;  %v1277_v57 = vrot.slane %v4036_v4, 5 }
  0x6a   : > { %3503 = vmatprep.mubr.msk.bf16.mxu0 %vm666_vm3, %v4302_v32  ;;  %v1271_v46 = vsel %vm4192_vm7, %v3125_v28, %v1270_v48  ;;  %v1272_v53 = vrot.slane %v1270_v48, 4  ;;  %v1256_v36 = vrot.slane %v3896_v62, 5  ;;  %v1280_v50 = vrot.slane %v4048_v38, 5 }
  0x6b   : > { %v4371_v47 = vcombine.low %v4075_v30, %v4082_v29  ;;  %v3127_v7 = vrot.slane %v4075_v30, 9  ;;  %v1246_v26 = vsel %vm4192_vm7, %v1244_v17, %v1245_v13  ;;  %v1278_v4 = vsel %vm4192_vm7, %v3126_v61, %v1277_v57  ;;  %v5310_v13 = vld [vmem:[#allocation23_spill] sm:$0xff]  ;;  %v5311_v61 = vld [vmem:[#allocation8_spill] sm:$0xff] }
  0x6c   : > { %3466 = vmatmul.mubr.msk.bf16.gmra.mxu1 %vm666_vm3, %v4321_v37  ;;  %v1274_v56 = vsel %vm4192_vm7, %v1272_v53, %v1273_v6  ;;  %v1279_v11 = vrot.slane %v1277_v57, 4  ;;  %v1284_v38 = vrot.slane %v4082_v29, 5  ;;  %v1287_v24 = vrot.slane %v5306_v45, 5 }
  0x6d   : > { %3469 = vmatprep.mubr.msk.bf16.mxu1 %vm666_vm3, %v4325_v41  ;;  %v4380_v34 = vcombine.low %v1271_v46, %v1274_v56  ;;  %v4386_v39 = vcombine.low %v5308_v3, %v5307_v14  ;;  %v3128_v40 = vrot.slane %v5308_v3, 9  ;;  %v1291_v27 = vrot.slane %v5307_v14, 5  ;;  %v5313_v14 = vld [vmem:[#allocation4_spill] sm:$0xff] }
  0x6e   : > { %v1281_v30 = vsel %vm4192_vm7, %v1279_v11, %v1280_v50  ;;  %v1294_v54 = vrot.slane %v5309_v44, 5  ;;  %v1285_v29 = vsel %vm4192_vm7, %v3127_v7, %v1284_v38  ;;  %v1286_v58 = vrot.slane %v1284_v38, 4 }
  0x6f   : > { %v4395_v12 = vcombine.low %v1278_v4, %v1281_v30  ;;  %v4401_v17 = vcombine.low %v5310_v13, %v4170_v15  ;;  %v1292_v28 = vsel %vm4192_vm7, %v3128_v40, %v1291_v27  ;;  %v1293_v48 = vrot.slane %v1291_v27, 4  ;;  %v5314_v40 = vld [vmem:[#allocation6_spill] sm:$0xff] }
  0x70   : > { %v3129_v6 = vrot.slane %v5310_v13, 9  ;;  %v1298_v46 = vrot.slane %v4170_v15, 5  ;;  %v1253_v53 = vsel %vm4192_vm7, %v1251_v59, %v1252_v31  ;;  %v1263_v57 = vrot.slane %v5311_v61, 5  ;;  %v5312_v59 = vld [vmem:[#allocation3_spill] sm:$0xff] }
  0x71   : > { %3504 = vmatmul.mubr.msk.bf16.gmra.mxu0 %vm666_vm3, %v4337_v43  ;;  %v1288_v50 = vsel %vm4192_vm7, %v1286_v58, %v1287_v24  ;;  %v1301_v7 = vrot.slane %v4181_v63, 5  ;;  %v1295_v4 = vsel %vm4192_vm7, %v1293_v48, %v1294_v54  ;;  %v4425_v31 = vcombine.low %v1243_v25, %v1246_v26  ;;  %v5315_v54 = vld [vmem:[#allocation9_spill] sm:$0xff] }
  0x72   : > { %3507 = vmatprep.mubr.msk.bf16.mxu0 %vm666_vm3, %v4339_v9  ;;  %v4417_v56 = vcombine.low %v1285_v29, %v1288_v50  ;;  %v1299_v15 = vsel %vm4192_vm7, %v3129_v6, %v1298_v46  ;;  %v1300_v11 = vrot.slane %v1298_v46, 4  ;;  %v3123_v38 = vrot.slane %v5312_v59, 9  ;;  %v4504_v6 = vld [vmem:[%s3825_s21 + $0xc0] sm:$0xf]  ;;  %v218_v46 = vld [vmem:[%s3825_s21 + $0xc8] sm:$0x1] }
  0x73   : > { %v4428_v63 = vcombine.low %v1292_v28, %v1295_v4  ;;  %v4430_v45 = vcombine.low %v1250_v52, %v1253_v53  ;;  %v1258_v24 = vrot.slane %v1256_v36, 4  ;;  %v1259_v3 = vrot.slane %v5313_v14, 5  ;;  %v5316_v4 = vld [vmem:[#allocation7_spill] sm:$0xff] }
  0x74   : > { %3470 = vmatmul.mubr.msk.bf16.gmra.mxu1 %vm666_vm3, %v4329_v33  ;;  %v1302_v30 = vsel %vm4192_vm7, %v1300_v11, %v1301_v7  ;;  %v3124_v27 = vrot.slane %v5314_v40, 9  ;;  %v1265_v44 = vrot.slane %v1263_v57, 4  ;;  %v1266_v29 = vrot.slane %v5315_v54, 5  ;;  %v5325_v54 = vld [vmem:[#allocation14_spill] sm:$0xff] }
  0x75   : > { %3473 = vmatprep.mubr.msk.bf16.mxu1 %vm666_vm3, %v4333_v20  ;;  %v4437_v58 = vcombine.low %v1299_v15, %v1302_v30  ;;  %v4441_v25 = vcombine.low %v4141_v55, %v4148_v1  ;;  %v4447_v52 = vcombine.low %v3851_v16, %v3856_v19  ;;  %v1257_v26 = vsel %vm4192_vm7, %v3123_v38, %v1256_v36  ;;  %v226_v38 = vld [vmem:[%s5227_s1 + $0x10] sm:$0x3]  ;;  %v5318_v30 = vld [vmem:[#allocation13_spill] sm:$0xff] }
  0x76   : > { %v1260_v13 = vsel %vm4192_vm7, %v1258_v24, %v1259_v3  ;;  %v1264_v55 = vsel %vm4192_vm7, %v3124_v27, %v1263_v57  ;;  %v1267_v1 = vsel %vm4192_vm7, %v1265_v44, %v1266_v29  ;;  %v4469_v36 = vcombine.low %v5312_v59, %v3896_v62  ;;  %v4498_v62 = vld [vmem:[%s3825_s21 + $0xc4] sm:$0xf]  ;;  %v5317_v24 = vld [vmem:[#allocation11_spill] sm:$0xff]  ;;  %v5324_v44 = vld [vmem:[#allocation12_spill] sm:$0xff] }
  0x77   : > { %v4463_v16 = vcombine.low %v1257_v26, %v1260_v13  ;;  %v4465_v19 = vcombine.low %v1264_v55, %v1267_v1  ;;  %v4475_v28 = vcombine.low %v5314_v40, %v5311_v61  ;;  %v2032_v48 = vrot.slane %v4498_v62, 5  ;;  %v5322_v40 = vld [vmem:[#allocation5_spill] sm:$0xff]  ;;  %v5323_v27 = vld [vmem:[#allocation10_spill] sm:$0xff] }
  0x78   : > { %v3197_v53 = vrot.slane %v4504_v6, 9  ;;  %v2035_v57 = vrot.slane %v218_v46, 5  ;;  %v3234_v11 = vcombine.low %v4280_v42, %v4280_v42  ;;  %v2252_v59 = vsel %vm715_vm0, %v4280_v42, 0  ;;  %v5321_v42 = vld [vmem:[#allocation24_spill] sm:$0xff] }
  0x79   : > { %3508 = vmatmul.mubr.msk.bf16.gmra.mxu0 %vm666_vm3, %v4425_v31  ;;  %v2034_v61 = vrot.slane %v2032_v48, 4  ;;  %v2048_v14 = vsel %vm715_vm0, %v4265_v5, 0  ;;  %v5320_v5 = vld [vmem:[#allocation19_spill] sm:$0xff]  ;;  %v1804_v29 = vshrl.u32 %v4504_v6, 16  ;;  %v1807_v26 = vshll.u32 %v4504_v6, 16 }
  0x7a   : > { %3511 = vmatprep.mubr.msk.bf16.mxu0 %vm666_vm3, %v4430_v45  ;;  %v2033_v50 = vsel %vm4192_vm7, %v3197_v53, %v2032_v48  ;;  %v2477_v3 = vrot.slane %v3234_v11, 2  ;;  %v1817_v13 = vshrl.u32 %v4498_v62, 16  ;;  %v1813_v55 = vshll.u32 %v4498_v62, 16 }
  0x7b   : > { %v2036_v7 = vsel %vm4192_vm7, %v2034_v61, %v2035_v57  ;;  %v1806_v1 = vrot.slane %v1804_v29, 4  ;;  %v1809_v48 = vrot.slane %v1807_v26, 5  ;;  %v5326_v57 = vld [vmem:[#allocation17_spill] sm:$0xff]  ;;  %v1823_v11 = vshll.u32 %v218_v46, 16 }
  0x7c   : > { %3474 = vmatmul.mubr.msk.bf16.gmra.mxu1 %vm666_vm3, %v4441_v25  ;;  %v4516_v15 = vcombine.low %v2033_v50, %v2036_v7  ;;  %v1815_v53 = vrot.slane %v1813_v55, 5  ;;  %v1819_v61 = vrot.slane %v1817_v13, 4  ;;  %v5327_v50 = vld [vmem:[#allocation22_spill] sm:$0xff]  ;;  %v3162_v55 = vcombine.low %v4504_v6, %v4498_v62 }
  0x7d   : > { %3477 = vmatprep.mubr.msk.bf16.mxu1 %vm666_vm3, %v4447_v52  ;;  %v1810_v7 = vor.u32 %v1809_v48, %v1806_v1  ;;  %v1825_v29 = vrot.slane %v1823_v11, 5  ;;  %v2692_v1 = vsel %vm715_vm0, %v226_v38, 0  ;;  %v2482_v48 = vsel %vm715_vm0, %v2477_v3, 0  ;;  %v4707_v11 = vld [vmem:[%s3825_s21 + $0xd0] sm:$0xf] }
  0x81   : > { %3512 = vmatmul.mubr.msk.bf16.gmra.mxu0 %vm666_vm3, %v4463_v16 }
  0x82   : > { %3515 = vmatprep.mubr.msk.bf16.mxu0 %vm666_vm3, %v4465_v19 }
  0x84   : > { %3478 = vmatmul.mubr.msk.bf16.gmra.mxu1 %vm666_vm3, %v4469_v36 }
  0x85   : > { %3481 = vmatprep.mubr.msk.bf16.mxu1 %vm666_vm3, %v4475_v28 }
  0x89   : > { %3516 = vmatmul.mubr.msk.bf16.gmra.mxu0 %vm666_vm3, %v4380_v34 }
  0x8a   : > { %3519 = vmatprep.mubr.msk.bf16.mxu0 %vm666_vm3, %v4395_v12 }
  0x8c   : > { %3482 = vmatmul.mubr.msk.bf16.gmra.mxu1 %vm666_vm3, %v4344_v23 }
  0x8d   : > { %3485 = vmatprep.mubr.msk.bf16.mxu1 %vm666_vm3, %v4357_v10 }
  0x91   : > { %3520 = vmatmul.mubr.msk.bf16.gmra.mxu0 %vm666_vm3, %v4417_v56 }
  0x92   : > { %3523 = vmatprep.mubr.msk.bf16.mxu0 %vm666_vm3, %v4428_v63 }
  0x94   : > { %3486 = vmatmul.mubr.msk.bf16.gmra.mxu1 %vm666_vm3, %v4371_v47 }
  0x95   : > { %3489 = vmatprep.mubr.msk.bf16.mxu1 %vm666_vm3, %v4386_v39 }
  0x99   : > { %3524 = vmatmul.mubr.msk.bf16.gmra.mxu0 %vm666_vm3, %v4437_v58 }
  0x9a   : > { %3563 = vmatprep.mubr.msk.bf16.mxu0 %vm666_vm3, %v5316_v4  ;;  %v1820_v4 = vor.u32 %v1819_v61, %v1815_v53 }
  0x9c   : > { %3490 = vmatmul.mubr.msk.bf16.gmra.mxu1 %vm666_vm3, %v4401_v17 }
  0x9d   : > { %3529 = vmatprep.mubr.msk.bf16.mxu1 %vm666_vm3, %v4204_v49  ;;  %v5319_v49 = vld [vmem:[#allocation15_spill] sm:$0xff] }
  0xa1   : > { %3564 = vmatmul.mubr.msk.bf16.vlgmr.msra.gmra.mxu0 %vm666_vm3, %v5317_v24 }
  0xa2   : > { %3630 = vmatpush3.bf16.msra.mxu0 %v2252_v59  ;;  %3567 = vmatprep.mubr.msk.bf16.mxu0 %vm666_vm3, %v5318_v30  ;;  %v1811_v59 = vrot.slane %v1810_v7, 4 }
  0xa3   : > { %3742 = vmatprep.subr.msk.bf16.mxu0 %vm715_vm0, %v226_v38 }
  0xa4   : > { %3530 = vmatmul.mubr.msk.bf16.vlgmr.msra.gmra.mxu1 %vm666_vm3, %v4231_v2  ;;  %v1816_v26 = vsel %vm3874_vm4, %v1811_v59, %v1815_v53 }
  0xa5   : > { %3596 = vmatpush3.bf16.msra.mxu1 %v2048_v14  ;;  %3533 = vmatprep.mubr.msk.bf16.mxu1 %vm666_vm3, %v4321_v37  ;;  %v1821_v14 = vrot.slane %v1820_v4, 4 }
  0xa6   : > { %3741 = vmatprep.subr.msk.bf16.mxu1 %vm715_vm0, %v2477_v3 }
  0xa7   : > { %v1826_v46 = vsel %vm3874_vm4, %v1821_v14, %v1825_v29 }
  0xa8   : > { %v4597_v13 = vcombine.low %v1816_v26, %v1826_v46 }
  0xa9   : > { %3568 = vmatmul.mubr.msk.bf16.gmra.mxu0 %vm666_vm3, %v5319_v49 }
  0xaa   : > { %3571 = vmatprep.mubr.msk.bf16.mxu0 %vm666_vm3, %v5320_v5  ;;  %5328 = vst [vmem:[#allocation16_spill] sm:$0xff] %v4597_v13 }
  0xac   : > { %3534 = vmatmul.mubr.msk.bf16.gmra.mxu1 %vm666_vm3, %v4325_v41 }
  0xad   : > { %3537 = vmatprep.mubr.msk.bf16.mxu1 %vm666_vm3, %v4329_v33 }
  0xb1   : > { %3572 = vmatmul.mubr.msk.bf16.gmra.mxu0 %vm666_vm3, %v5321_v42 }
  0xb2   : > { %3575 = vmatprep.mubr.msk.bf16.mxu0 %vm666_vm3, %v4213_v18 }
  0xb4   : > { %3538 = vmatmul.mubr.msk.bf16.gmra.mxu1 %vm666_vm3, %v4333_v20 }
  0xb5   : > { %3541 = vmatprep.mubr.msk.bf16.mxu1 %vm666_vm3, %v4441_v25 }
  0xb9   : > { %3576 = vmatmul.mubr.msk.bf16.gmra.mxu0 %vm666_vm3, %v5322_v40 }
  0xba   : > { %3579 = vmatprep.mubr.msk.bf16.mxu0 %vm666_vm3, %v5323_v27 }
  0xbc   : > { %3542 = vmatmul.mubr.msk.bf16.gmra.mxu1 %vm666_vm3, %v4447_v52 }
  0xbd   : > { %3545 = vmatprep.mubr.msk.bf16.mxu1 %vm666_vm3, %v4469_v36 }
  0xc1   : > { %3580 = vmatmul.mubr.msk.bf16.gmra.mxu0 %vm666_vm3, %v5324_v44 }
  0xc2   : > { %3583 = vmatprep.mubr.msk.bf16.mxu0 %vm666_vm3, %v5325_v54 }
  0xc4   : > { %3546 = vmatmul.mubr.msk.bf16.gmra.mxu1 %vm666_vm3, %v4475_v28 }
  0xc5   : > { %3549 = vmatprep.mubr.msk.bf16.mxu1 %vm666_vm3, %v4344_v23 }
  0xc9   : > { %3584 = vmatmul.mubr.msk.bf16.gmra.mxu0 %vm666_vm3, %v5326_v57 }
  0xca   : > { %3587 = vmatprep.mubr.msk.bf16.mxu0 %vm666_vm3, %v5327_v50 }
  0xcc   : > { %3550 = vmatmul.mubr.msk.bf16.gmra.mxu1 %vm666_vm3, %v4357_v10 }
  0xcd   : > { %3553 = vmatprep.mubr.msk.bf16.mxu1 %vm666_vm3, %v4371_v47 }
  0xd1   : > { %3588 = vmatmul.mubr.msk.bf16.gmra.mxu0 %vm666_vm3, %v4187_v8 }
  0xd2   : > { %3591 = vmatprep.mubr.msk.bf16.mxu0 %vm666_vm3, %v4241_v21 }
  0xd4   : > { %3554 = vmatmul.mubr.msk.bf16.gmra.mxu1 %vm666_vm3, %v4386_v39 }
  0xd5   : > { %3557 = vmatprep.mubr.msk.bf16.mxu1 %vm666_vm3, %v4401_v17 }
  0xd9   : > { %3592 = vmatmul.mubr.msk.bf16.gmra.mxu0 %vm666_vm3, %v4597_v13 }
  0xda   : > { %3631 = vmatprep.mubr.msk.bf16.mxu0 %vm666_vm3, %v4231_v2 }
  0xdc   : > { %3558 = vmatmul.mubr.msk.bf16.gmra.mxu1 %vm666_vm3, %v3162_v55 }
  0xdd   : > { %3597 = vmatprep.mubr.msk.bf16.mxu1 %vm666_vm3, %v4238_v51 }
  0xe1   : > { %3632 = vmatmul.mubr.msk.bf16.vlgmr.msra.gmra.mxu0 %vm666_vm3, %v4321_v37 }
  0xe2   : > { %3698 = vmatpush3.bf16.msra.mxu0 %v2692_v1  ;;  %3635 = vmatprep.mubr.msk.bf16.mxu0 %vm666_vm3, %v4325_v41 }
  0xe4   : > { %3598 = vmatmul.mubr.msk.bf16.vlgmr.msra.gmra.mxu1 %vm666_vm3, %v4263_v60 }
  0xe5   : > { %3664 = vmatpush3.bf16.msra.mxu1 %v2482_v48  ;;  %3601 = vmatprep.mubr.msk.bf16.mxu1 %vm666_vm3, %v4300_v22  ;;  %v4620_v2 = vpop.f32.mrf.mxu0 }
  0xe7   : > { %v4630_v37 = vpop.f32.mrf.mxu0 }
  0xe9   : > { %3636 = vmatmul.mubr.msk.bf16.gmra.mxu0 %vm666_vm3, %v4329_v33  ;;  %v4636_v33 = vpop.f32.mrf.mxu0 }
  0xea   : > { %3639 = vmatprep.mubr.msk.bf16.mxu0 %vm666_vm3, %v4333_v20  ;;  %v4626_v51 = vpop.f32.mrf.mxu1 }
  0xeb   : > { %v4646_v62 = vpop.f32.mrf.mxu0 }
  0xec   : > { %3602 = vmatmul.mubr.msk.bf16.gmra.mxu1 %vm666_vm3, %v4302_v32  ;;  %v4632_v41 = vpop.f32.mrf.mxu1 }
  0xed   : > { %3605 = vmatprep.mubr.msk.bf16.mxu1 %vm666_vm3, %v4337_v43 }
  0xee   : > { %v4642_v20 = vpop.f32.mrf.mxu1 }
  0xf0   : > { %v4648_v6 = vpop.f32.mrf.mxu1 }
  0xf1   : > { %3640 = vmatmul.mubr.msk.bf16.gmra.mxu0 %vm666_vm3, %v4441_v25 }
  0xf2   : > { %3643 = vmatprep.mubr.msk.bf16.mxu0 %vm666_vm3, %v4447_v52 }
  0xf4   : > { %3606 = vmatmul.mubr.msk.bf16.gmra.mxu1 %vm666_vm3, %v4339_v9 }
  0xf5   : > { %3609 = vmatprep.mubr.msk.bf16.mxu1 %vm666_vm3, %v4425_v31 }
  0xf6   : > { %v4652_v25 = vpop.f32.mrf.mxu0 }
  0xf8   : > { %v4662_v38 = vpop.f32.mrf.mxu0 }
  0xf9   : > { %3644 = vmatmul.mubr.msk.bf16.gmra.mxu0 %vm666_vm3, %v4469_v36 }
  0xfa   : > { %3647 = vmatprep.mubr.msk.bf16.mxu0 %vm666_vm3, %v4475_v28  ;;  %v4658_v52 = vpop.f32.mrf.mxu1  ;;  %v4668_v36 = vpop.f32.mrf.mxu0 }
  0xfc   : > { %3610 = vmatmul.mubr.msk.bf16.gmra.mxu1 %vm666_vm3, %v4430_v45  ;;  %v4664_v3 = vpop.f32.mrf.mxu1  ;;  %v4678_v53 = vpop.f32.mrf.mxu0 }
  0xfd   : > { %3613 = vmatprep.mubr.msk.bf16.mxu1 %vm666_vm3, %v4463_v16 }
  0xfe   : > { %v4674_v28 = vpop.f32.mrf.mxu1 }
 0x100   : > { %v4680_v61 = vpop.f32.mrf.mxu1 }
 0x101   : > { %3648 = vmatmul.mubr.msk.bf16.gmra.mxu0 %vm666_vm3, %v4344_v23 }
 0x102   : > { %3651 = vmatprep.mubr.msk.bf16.mxu0 %vm666_vm3, %v4357_v10 }
 0x104   : > { %3614 = vmatmul.mubr.msk.bf16.gmra.mxu1 %vm666_vm3, %v4465_v19 }
 0x105   : > { %3617 = vmatprep.mubr.msk.bf16.mxu1 %vm666_vm3, %v4380_v34 }
 0x107   : > { %v4684_v23 = vpop.f32.mrf.mxu0 }
 0x109   : > { %3652 = vmatmul.mubr.msk.bf16.gmra.mxu0 %vm666_vm3, %v4371_v47  ;;  %v4694_v7 = vpop.f32.mrf.mxu0 }
 0x10a   : > { %3655 = vmatprep.mubr.msk.bf16.mxu0 %vm666_vm3, %v4386_v39  ;;  %v4704_v39 = vld [vmem:[%s3825_s21 + $0xcc] sm:$0xf] }
 0x10b   : > { %v4700_v47 = vpop.f32.mrf.mxu0 }
 0x10c   : > { %3618 = vmatmul.mubr.msk.bf16.gmra.mxu1 %vm666_vm3, %v4395_v12  ;;  %v4690_v10 = vpop.f32.mrf.mxu1 }
 0x10d   : > { %5329 = vst [vmem:[#allocation20_spill] sm:$0xff] %v4690_v10  ;;  %3621 = vmatprep.mubr.msk.bf16.mxu1 %vm666_vm3, %v4417_v56  ;;  %v4713_v14 = vpop.f32.mrf.mxu0 }
 0x10e   : > { %v4696_v4 = vpop.f32.mrf.mxu1 }
 0x10f   : > { %5330 = vst [vmem:[#allocation18_spill] sm:$0xff] %v4696_v4 }
 0x110   : > { %v4711_v59 = vpop.f32.mrf.mxu1 }
 0x111   : > { %3656 = vmatmul.mubr.msk.bf16.gmra.mxu0 %vm666_vm3, %v4401_v17  ;;  %5331 = vst [vmem:[#allocation21_spill] sm:$0xff] %v4711_v59  ;;  %v3216_v17 = vcombine.low %v4704_v39, %v4707_v11 }
 0x112   : > { %3659 = vmatprep.mubr.msk.bf16.mxu0 %vm666_vm3, %v3162_v55  ;;  %v4719_v29 = vpop.f32.mrf.mxu1 }
 0x113   : > { %5332 = vst [vmem:[#allocation23_spill] sm:$0xff] %v4719_v29 }
 0x114   : > { %3622 = vmatmul.mubr.msk.bf16.gmra.mxu1 %vm666_vm3, %v4428_v63 }
 0x115   : > { %3625 = vmatprep.mubr.msk.bf16.mxu1 %vm666_vm3, %v4437_v58 }
 0x119   : > { %v4721_v26 = vpop.f32.mrf.mxu0  ;;  %3660 = vmatmul.mubr.msk.bf16.gmra.mxu0 %vm666_vm3, %v3216_v17 }
 0x11a   : > { %3699 = vmatprep.mubr.msk.bf16.mxu0 %vm666_vm3, %v4263_v60 }
 0x11b   : > { %v4726_v46 = vpop.f32.mrf.mxu0 }
 0x11c   : > { %v4728_v55 = vpop.f32.mrf.mxu1  ;;  %3626 = vmatmul.mubr.msk.bf16.gmra.mxu1 %vm666_vm3, %v4516_v15 }
 0x11d   : > { %5333 = vst [vmem:[#allocation8_spill] sm:$0xff] %v4728_v55  ;;  %v4732_v1 = vpop.f32.mrf.mxu0  ;;  %3665 = vmatprep.mubr.msk.bf16.mxu1 %vm666_vm3, %v5317_v24 }
 0x11e   : > { %v4736_v48 = vpop.f32.mrf.mxu1 }
 0x11f   : > { %5334 = vst [vmem:[#allocation3_spill] sm:$0xff] %v4736_v48  ;;  %v4738_v29 = vpop.f32.mrf.mxu0 }
 0x120   : > { %v4740_v17 = vpop.f32.mrf.mxu1 }
 0x121   : > { %5335 = vst [vmem:[#allocation4_spill] sm:$0xff] %v4740_v17  ;;  %v3497_v59 = vpop.f32.mrf.mxu0  ;;  %3700 = vmatmul.mubr.msk.bf16.vlgmr.msra.gmra.mxu0 %vm666_vm3, %v4300_v22 }
 0x122   : > { %v4744_v60 = vpop.f32.mrf.mxu1  ;;  %3703 = vmatprep.mubr.msk.bf16.mxu0 %vm666_vm3, %v4302_v32 }
 0x123   : > { %5336 = vst [vmem:[#allocation6_spill] sm:$0xff] %v4744_v60  ;;  %v1436_v55 = vpop.f32.mrf.mxu0 }
 0x124   : > { %v3463_v4 = vpop.f32.mrf.mxu1  ;;  %3666 = vmatmul.mubr.msk.bf16.vlgmr.msra.gmra.mxu1 %vm666_vm3, %v5318_v30 }
 0x125   : > { %v1054_v24 = vadd.f32 %v3463_v4, %v4620_v2  ;;  %v3498_v48 = vpop.f32.mrf.mxu0  ;;  %3669 = vmatprep.mubr.msk.bf16.mxu1 %vm666_vm3, %v5319_v49 }
 0x126   : > { %v1045_v17 = vpop.f32.mrf.mxu1 }
 0x127   : > { %v4753_v13 = vadd.f32 %v3497_v59, %v1054_v24  ;;  %v1046_v22 = vadd.f32 %v1045_v17, %v4630_v37  ;;  %v1439_v60 = vpop.f32.mrf.mxu0 }
 0x128   : > { %v3464_v10 = vpop.f32.mrf.mxu1 }
 0x129   : > { %v4756_v35 = vadd.f32 %v1436_v55, %v1046_v22  ;;  %v1057_v32 = vadd.f32 %v3464_v10, %v4636_v33  ;;  %v3501_v21 = vpop.f32.mrf.mxu0  ;;  %3704 = vmatmul.mubr.msk.bf16.gmra.mxu0 %vm666_vm3, %v4337_v43 }
 0x12a   : > { %v1048_v30 = vpop.f32.mrf.mxu1  ;;  %3707 = vmatprep.mubr.msk.bf16.mxu0 %vm666_vm3, %v4339_v9 }
 0x12b   : > { %v4763_v49 = vadd.f32 %v3498_v48, %v1057_v32  ;;  %v1049_v2 = vadd.f32 %v1048_v30, %v4646_v62  ;;  %v1452_v4 = vpop.f32.mrf.mxu0 }
 0x12c   : > { %v3467_v37 = vpop.f32.mrf.mxu1  ;;  %3670 = vmatmul.mubr.msk.bf16.gmra.mxu1 %vm666_vm3, %v5320_v5 }
 0x12d   : > { %v4768_v59 = vadd.f32 %v1439_v60, %v1049_v2  ;;  %v1070_v33 = vadd.f32 %v3467_v37, %v4652_v25  ;;  %v3502_v10 = vpop.f32.mrf.mxu0  ;;  %3673 = vmatprep.mubr.msk.bf16.mxu1 %vm666_vm3, %v5321_v42 }
 0x12e   : > { %v1061_v43 = vpop.f32.mrf.mxu1 }
 0x12f   : > { %v4773_v55 = vadd.f32 %v3501_v21, %v1070_v33  ;;  %v1062_v9 = vadd.f32 %v1061_v43, %v4662_v38  ;;  %v1455_v48 = vpop.f32.mrf.mxu0 }
 0x130   : > { %v3468_v62 = vpop.f32.mrf.mxu1 }
 0x131   : > { %v4776_v17 = vadd.f32 %v1452_v4, %v1062_v9  ;;  %v1073_v24 = vadd.f32 %v3468_v62, %v4668_v36  ;;  %v3505_v5 = vpop.f32.mrf.mxu0  ;;  %3708 = vmatmul.mubr.msk.bf16.gmra.mxu0 %vm666_vm3, %v4425_v31 }
 0x132   : > { %v1064_v25 = vpop.f32.mrf.mxu1  ;;  %3711 = vmatprep.mubr.msk.bf16.mxu0 %vm666_vm3, %v4430_v45 }
 0x133   : > { %v4783_v42 = vadd.f32 %v3502_v10, %v1073_v24  ;;  %v1065_v21 = vadd.f32 %v1064_v25, %v4678_v53  ;;  %v1468_v60 = vpop.f32.mrf.mxu0 }
 0x134   : > { %v3471_v38 = vpop.f32.mrf.mxu1  ;;  %3674 = vmatmul.mubr.msk.bf16.gmra.mxu1 %vm666_vm3, %v4213_v18 }
 0x135   : > { %v4788_v22 = vadd.f32 %v1455_v48, %v1065_v21  ;;  %v1086_v36 = vadd.f32 %v3471_v38, %v4684_v23  ;;  %v3506_v32 = vpop.f32.mrf.mxu0  ;;  %3677 = vmatprep.mubr.msk.bf16.mxu1 %vm666_vm3, %v5322_v40 }
 0x136   : > { %v1077_v31 = vpop.f32.mrf.mxu1 }
 0x137   : > { %v4793_v30 = vadd.f32 %v3505_v5, %v1086_v36  ;;  %v1078_v45 = vadd.f32 %v1077_v31, %v4694_v7  ;;  %v1471_v2 = vpop.f32.mrf.mxu0 }
 0x138   : > { %v3472_v53 = vpop.f32.mrf.mxu1 }
 0x139   : > { %v4796_v4 = vadd.f32 %v1468_v60, %v1078_v45  ;;  %v1089_v37 = vadd.f32 %v3472_v53, %v4700_v47  ;;  %v3509_v18 = vpop.f32.mrf.mxu0  ;;  %3712 = vmatmul.mubr.msk.bf16.gmra.mxu0 %vm666_vm3, %v4463_v16  ;;  %v2451_v60 = vshll.u32 %v4704_v39, 16 }
 0x13a   : > { %v1080_v23 = vpop.f32.mrf.mxu1  ;;  %3715 = vmatprep.mubr.msk.bf16.mxu0 %vm666_vm3, %v4465_v19 }
 0x13b   : > { %v4803_v40 = vadd.f32 %v3506_v32, %v1089_v37  ;;  %v1081_v33 = vadd.f32 %v1080_v23, %v4713_v14  ;;  %v1484_v10 = vpop.f32.mrf.mxu0  ;;  %v2453_v53 = vrot.slane %v2451_v60, 5 }
 0x13c   : > { %v3475_v7 = vpop.f32.mrf.mxu1  ;;  %3678 = vmatmul.mubr.msk.bf16.gmra.mxu1 %vm666_vm3, %v5323_v27 }
 0x13d   : > { %v4808_v43 = vadd.f32 %v1471_v2, %v1081_v33  ;;  %v1102_v47 = vadd.f32 %v3475_v7, %v4721_v26  ;;  %v3510_v9 = vpop.f32.mrf.mxu0  ;;  %3681 = vmatprep.mubr.msk.bf16.mxu1 %vm666_vm3, %v5324_v44 }
 0x13e   : > { %v1093_v16 = vpop.f32.mrf.mxu1 }
 0x13f   : > { %v4813_v48 = vadd.f32 %v3509_v18, %v1102_v47  ;;  %v1094_v19 = vadd.f32 %v1093_v16, %v4726_v46  ;;  %v1487_v62 = vpop.f32.mrf.mxu0  ;;  %v2448_v46 = vshrl.u32 %v4704_v39, 16 }
 0x140   : > { %v3476_v14 = vpop.f32.mrf.mxu1 }
 0x141   : > { %v4816_v24 = vadd.f32 %v1484_v10, %v1094_v19  ;;  %v1105_v5 = vadd.f32 %v3476_v14, %v4732_v1  ;;  %v3513_v27 = vpop.f32.mrf.mxu0  ;;  %3716 = vmatmul.mubr.msk.bf16.gmra.mxu0 %vm666_vm3, %v4380_v34  ;;  %v2457_v1 = vshll.u32 %v4707_v11, 16  ;;  %v2461_v34 = vshrl.u32 %v4707_v11, 16 }
 0x142   : > { %v1096_v26 = vpop.f32.mrf.mxu1  ;;  %3719 = vmatprep.mubr.msk.bf16.mxu0 %vm666_vm3, %v4395_v12 }
 0x143   : > { %v4823_v44 = vadd.f32 %v3510_v9, %v1105_v5  ;;  %v1097_v25 = vadd.f32 %v1096_v26, %v4738_v29  ;;  %v1500_v21 = vpop.f32.mrf.mxu0  ;;  %v2459_v18 = vrot.slane %v2457_v1, 5  ;;  %v2463_v23 = vrot.slane %v2461_v34, 4 }
 0x144   : > { %v3479_v38 = vpop.f32.mrf.mxu1  ;;  %3682 = vmatmul.mubr.msk.bf16.gmra.mxu1 %vm666_vm3, %v5325_v54  ;;  %v2450_v54 = vrot.slane %v2448_v46, 4  ;;  %v3251_v5 = vrot.slane %v4704_v39, 9 }
 0x145   : > { %v4832_v36 = vadd.f32 %v1487_v62, %v1097_v25  ;;  %v1118_v12 = vadd.f32 %v3479_v38, %v4626_v51  ;;  %v3514_v32 = vpop.f32.mrf.mxu0  ;;  %3685 = vmatprep.mubr.msk.bf16.mxu1 %vm666_vm3, %v5326_v57  ;;  %v2680_v57 = vrot.slane %v4707_v11, 5 }
 0x146   : > { %v1109_v29 = vpop.f32.mrf.mxu1 }
 0x147   : > { %v4837_v31 = vadd.f32 %v3513_v27, %v1118_v12  ;;  %v1110_v45 = vadd.f32 %v1109_v29, %v4632_v41  ;;  %v1503_v2 = vpop.f32.mrf.mxu0  ;;  %v221_v41 = vld [vmem:[%s3825_s21 + $0xd4] sm:$0x1] }
 0x148   : > { %v3480_v37 = vpop.f32.mrf.mxu1  ;;  %v2467_v14 = vshll.u32 %v221_v41, 16  ;;  %v2683_v26 = vrot.slane %v221_v41, 5 }
 0x149   : > { %v4840_v33 = vadd.f32 %v1500_v21, %v1110_v45  ;;  %v1121_v51 = vadd.f32 %v3480_v37, %v4642_v20  ;;  %v3517_v10 = vpop.f32.mrf.mxu0  ;;  %3720 = vmatmul.mubr.msk.bf16.gmra.mxu0 %vm666_vm3, %v4417_v56  ;;  %v2454_v20 = vor.u32 %v2453_v53, %v2450_v54 }
 0x14a   : > { %v1112_v7 = vpop.f32.mrf.mxu1  ;;  %3723 = vmatprep.mubr.msk.bf16.mxu0 %vm666_vm3, %v4428_v63  ;;  %v2464_v63 = vor.u32 %v2463_v23, %v2459_v18  ;;  %v2469_v39 = vrot.slane %v2467_v14, 5 }
 0x14b   : > { %v4849_v47 = vadd.f32 %v3514_v32, %v1121_v51  ;;  %v1113_v9 = vadd.f32 %v1112_v7, %v4648_v6  ;;  %v1516_v16 = vpop.f32.mrf.mxu0  ;;  %v2682_v6 = vrot.slane %v2680_v57, 4  ;;  %v2455_v60 = vrot.slane %v2454_v20, 4  ;;  %v5340_v51 = vld [vmem:[#allocation16_spill] sm:$0xff]  ;;  %v5341_v7 = vld [vmem:[#allocation18_spill] sm:$0xff]  ;;  %v5342_v20 = vld [vmem:[#allocation21_spill] sm:$0xff] }
 0x14c   : > { %v3483_v19 = vpop.f32.mrf.mxu1  ;;  %3686 = vmatmul.mubr.msk.bf16.gmra.mxu1 %vm666_vm3, %v5327_v50 }
 0x14d   : > { %v4854_v62 = vadd.f32 %v1503_v2, %v1113_v9  ;;  %v1134_v56 = vadd.f32 %v3483_v19, %v4658_v52  ;;  %v3518_v11 = vpop.f32.mrf.mxu0  ;;  %3689 = vmatprep.mubr.msk.bf16.mxu1 %vm666_vm3, %v4187_v8  ;;  %v2465_v8 = vrot.slane %v2464_v63, 4  ;;  %v2684_v12 = vsel %vm4192_vm7, %v2682_v6, %v2683_v26  ;;  %v5337_v2 = vld [vmem:[#allocation25_spill] sm:$0xff] }
 0x14e   : > { %v1125_v27 = vpop.f32.mrf.mxu1  ;;  %v2460_v54 = vsel %vm3874_vm4, %v2455_v60, %v2459_v18 }
 0x14f   : > { %v4860_v25 = vadd.f32 %v3517_v10, %v1134_v56  ;;  %v1126_v50 = vadd.f32 %v1125_v27, %v4664_v3  ;;  %v1519_v21 = vpop.f32.mrf.mxu0  ;;  %v2681_v3 = vsel %vm4192_vm7, %v3251_v5, %v2680_v57  ;;  %v2470_v0 = vsel %vm3874_vm4, %v2465_v8, %v2469_v39  ;;  %v5343_v5 = vld [vmem:[#allocation23_spill] sm:$0xff] }
 0x150   : > { %v3484_v46 = vpop.f32.mrf.mxu1  ;;  %v3233_v18 = vcombine.low %v2460_v54, %v2470_v0  ;;  %v5345_v8 = vld [vmem:[#allocation3_spill] sm:$0xff]  ;;  %v5347_v54 = vld [vmem:[#allocation6_spill] sm:$0xff] }
 0x151   : > { %v4863_v38 = vadd.f32 %v1516_v16, %v1126_v50  ;;  %v1137_v52 = vadd.f32 %v3484_v46, %v4674_v28  ;;  %v3521_v1 = vpop.f32.mrf.mxu0  ;;  %3724 = vmatmul.mubr.msk.bf16.gmra.mxu0 %vm666_vm3, %v4437_v58 }
 0x152   : > { %v1128_v34 = vpop.f32.mrf.mxu1  ;;  %3727 = vmatprep.mubr.msk.bf16.mxu0 %vm666_vm3, %v4516_v15  ;;  %v5339_v15 = vld [vmem:[#allocation20_spill] sm:$0xff] }
 0x153   : > { %v4874_v32 = vadd.f32 %v3518_v11, %v1137_v52  ;;  %v1129_v28 = vadd.f32 %v1128_v34, %v4680_v61  ;;  %v1532_v29 = vpop.f32.mrf.mxu0  ;;  %v3252_v61 = vcombine.low %v2681_v3, %v2684_v12 }
 0x154   : > { %v3487_v45 = vpop.f32.mrf.mxu1  ;;  %3690 = vmatmul.mubr.msk.bf16.gmra.mxu1 %vm666_vm3, %v5337_v2 }
 0x155   : > { %v4881_v53 = vadd.f32 %v1519_v21, %v1129_v28  ;;  %v1150_v37 = vadd.f32 %v3487_v45, %v5339_v15  ;;  %v3522_v23 = vpop.f32.mrf.mxu0  ;;  %3693 = vmatprep.mubr.msk.bf16.mxu1 %vm666_vm3, %v5340_v51  ;;  %v5344_v21 = vld [vmem:[#allocation8_spill] sm:$0xff] }
 0x156   : > { %v1141_v10 = vpop.f32.mrf.mxu1  ;;  %v5346_v28 = vld [vmem:[#allocation4_spill] sm:$0xff] }
 0x157   : > { %v4888_v57 = vadd.f32 %v3521_v1, %v1150_v37  ;;  %v1142_v41 = vadd.f32 %v1141_v10, %v5341_v7  ;;  %v1535_v9 = vpop.f32.mrf.mxu0 }
 0x158   : > { %v3488_v16 = vpop.f32.mrf.mxu1 }
 0x159   : > { %v4891_v19 = vadd.f32 %v1532_v29, %v1142_v41  ;;  %v1153_v56 = vadd.f32 %v3488_v16, %v5342_v20  ;;  %v3525_v11 = vpop.f32.mrf.mxu0  ;;  %3728 = vmatmul.mubr.msk.bf16.gmra.mxu0 %vm666_vm3, %v3252_v61 }
 0x15a   : > { %v1144_v63 = vpop.f32.mrf.mxu1 }
 0x15b   : > { %v4895_v14 = vadd.f32 %v3522_v23, %v1153_v56  ;;  %v1145_v27 = vadd.f32 %v1144_v63, %v5343_v5  ;;  %v1548_v6 = vpop.f32.mrf.mxu0 }
 0x15c   : > { %v3491_v26 = vpop.f32.mrf.mxu1  ;;  %3694 = vmatmul.mubr.msk.bf16.gmra.mxu1 %vm666_vm3, %v3233_v18 }
 0x15d   : > { %v4899_v50 = vadd.f32 %v1535_v9, %v1145_v27  ;;  %v1166_v46 = vadd.f32 %v3491_v26, %v5344_v21  ;;  %v3526_v60 = vpop.f32.mrf.mxu0 }
 0x15e   : > { %v1157_v52 = vpop.f32.mrf.mxu1 }
 0x15f   : > { %v4902_v1 = vadd.f32 %v3525_v11, %v1166_v46  ;;  %v1158_v39 = vadd.f32 %v1157_v52, %v5345_v8  ;;  %v1551_v34 = vpop.f32.mrf.mxu0 }
 0x160   : > { %v3492_v3 = vpop.f32.mrf.mxu1 }
 0x161   : > { %v4905_v12 = vadd.f32 %v1548_v6, %v1158_v39  ;;  %v1169_v29 = vadd.f32 %v3492_v3, %v5346_v28  ;;  %v3565_v45 = vpop.f32.mrf.mxu0 }
 0x162   : > { %v1160_v2 = vpop.f32.mrf.mxu1 }
 0x163   : > { %v4908_v58 = vadd.f32 %v3526_v60, %v1169_v29  ;;  %v1161_v15 = vadd.f32 %v1160_v2, %v5347_v54  ;;  %v1870_v37 = vpop.f32.mrf.mxu0 }
 0x164   : > { %v3531_v23 = vpop.f32.mrf.mxu1 }
 0x165   : > { %v4911_v51 = vadd.f32 %v1551_v34, %v1161_v15  ;;  %v1773_v0 = vadd.f32 %v3531_v23, %v4753_v13  ;;  %v3566_v61 = vpop.f32.mrf.mxu0 }
 0x166   : > { %v1644_v10 = vpop.f32.mrf.mxu1 }
 0x167   : > { %v4914_v7 = vadd.f32 %v3565_v45, %v1773_v0  ;;  %v1771_v41 = vadd.f32 %v1644_v10, %v4756_v35  ;;  %v1873_v9 = vpop.f32.mrf.mxu0 }
 0x168   : > { %v3532_v16 = vpop.f32.mrf.mxu1 }
 0x169   : > { %v4917_v18 = vadd.f32 %v1870_v37, %v1771_v41  ;;  %v1774_v20 = vadd.f32 %v3532_v16, %v4763_v49  ;;  %v3569_v56 = vpop.f32.mrf.mxu0 }
 0x16a   : > { %v1647_v11 = vpop.f32.mrf.mxu1 }
 0x16b   : > { %v4920_v63 = vadd.f32 %v3566_v61, %v1774_v20  ;;  %v1772_v5 = vadd.f32 %v1647_v11, %v4768_v59  ;;  %v1886_v27 = vpop.f32.mrf.mxu0 }
 0x16c   : > { %v3535_v13 = vpop.f32.mrf.mxu1 }
 0x16d   : > { %v4923_v6 = vadd.f32 %v1873_v9, %v1772_v5  ;;  %v1777_v26 = vadd.f32 %v3535_v13, %v4773_v55  ;;  %v3570_v21 = vpop.f32.mrf.mxu0 }
 0x16e   : > { %v1660_v35 = vpop.f32.mrf.mxu1 }
 0x16f   : > { %v4926_v46 = vadd.f32 %v3569_v56, %v1777_v26  ;;  %v1775_v60 = vadd.f32 %v1660_v35, %v4776_v17  ;;  %v1889_v52 = vpop.f32.mrf.mxu0 }
 0x170   : > { %v3536_v49 = vpop.f32.mrf.mxu1 }
 0x171   : > { %v4929_v8 = vadd.f32 %v1886_v27, %v1775_v60  ;;  %v1778_v39 = vadd.f32 %v3536_v49, %v4783_v42  ;;  %v3573_v34 = vpop.f32.mrf.mxu0 }
 0x172   : > { %v1663_v59 = vpop.f32.mrf.mxu1 }
 0x173   : > { %v4932_v3 = vadd.f32 %v3570_v21, %v1778_v39  ;;  %v1776_v28 = vadd.f32 %v1663_v59, %v4788_v22  ;;  %v1902_v29 = vpop.f32.mrf.mxu0 }
 0x174   : > { %v3539_v55 = vpop.f32.mrf.mxu1 }
 0x175   : > { %v4935_v45 = vadd.f32 %v1889_v52, %v1776_v28  ;;  %v1781_v2 = vadd.f32 %v3539_v55, %v4793_v30  ;;  %v3574_v54 = vpop.f32.mrf.mxu0 }
 0x176   : > { %v1676_v17 = vpop.f32.mrf.mxu1 }
 0x177   : > { %v4938_v15 = vadd.f32 %v3573_v34, %v1781_v2  ;;  %v1779_v37 = vadd.f32 %v1676_v17, %v4796_v4  ;;  %v1905_v23 = vpop.f32.mrf.mxu0 }
 0x178   : > { %v3540_v42 = vpop.f32.mrf.mxu1 }
 0x179   : > { %v4941_v0 = vadd.f32 %v1902_v29, %v1779_v37  ;;  %v1782_v61 = vadd.f32 %v3540_v42, %v4803_v40  ;;  %v3577_v10 = vpop.f32.mrf.mxu0 }
 0x17a   : > { %v1679_v22 = vpop.f32.mrf.mxu1 }
 0x17b   : > { %v4944_v41 = vadd.f32 %v3574_v54, %v1782_v61  ;;  %v1780_v9 = vadd.f32 %v1679_v22, %v4808_v43  ;;  %v1918_v16 = vpop.f32.mrf.mxu0 }
 0x17c   : > { %v3543_v30 = vpop.f32.mrf.mxu1 }
 0x17d   : > { %v4947_v20 = vadd.f32 %v1905_v23, %v1780_v9  ;;  %v1785_v56 = vadd.f32 %v3543_v30, %v4813_v48  ;;  %v3578_v11 = vpop.f32.mrf.mxu0 }
 0x17e   : > { %v1692_v4 = vpop.f32.mrf.mxu1 }
 0x17f   : > { %v4950_v5 = vadd.f32 %v3577_v10, %v1785_v56  ;;  %v1783_v27 = vadd.f32 %v1692_v4, %v4816_v24  ;;  %v1921_v13 = vpop.f32.mrf.mxu0 }
 0x180   : > { %v3544_v40 = vpop.f32.mrf.mxu1 }
 0x181   : > { %v4953_v26 = vadd.f32 %v1918_v16, %v1783_v27  ;;  %v1786_v21 = vadd.f32 %v3544_v40, %v4823_v44  ;;  %v3581_v35 = vpop.f32.mrf.mxu0 }
 0x182   : > { %v1695_v43 = vpop.f32.mrf.mxu1 }
 0x183   : > { %v4956_v60 = vadd.f32 %v3578_v11, %v1786_v21  ;;  %v1784_v52 = vadd.f32 %v1695_v43, %v4832_v36  ;;  %v1934_v49 = vpop.f32.mrf.mxu0 }
 0x184   : > { %v3547_v48 = vpop.f32.mrf.mxu1 }
 0x185   : > { %v4959_v39 = vadd.f32 %v1921_v13, %v1784_v52  ;;  %v1789_v34 = vadd.f32 %v3547_v48, %v4837_v31  ;;  %v3582_v59 = vpop.f32.mrf.mxu0 }
 0x186   : > { %v1708_v24 = vpop.f32.mrf.mxu1 }
 0x187   : > { %v4962_v28 = vadd.f32 %v3581_v35, %v1789_v34  ;;  %v1787_v29 = vadd.f32 %v1708_v24, %v4840_v33  ;;  %v1937_v55 = vpop.f32.mrf.mxu0 }
 0x188   : > { %v3548_v44 = vpop.f32.mrf.mxu1 }
 0x189   : > { %v4965_v2 = vadd.f32 %v1934_v49, %v1787_v29  ;;  %v1790_v54 = vadd.f32 %v3548_v44, %v4849_v47  ;;  %v3585_v17 = vpop.f32.mrf.mxu0 }
 0x18a   : > { %v1711_v36 = vpop.f32.mrf.mxu1 }
 0x18b   : > { %v4968_v37 = vadd.f32 %v3582_v59, %v1790_v54  ;;  %v1788_v23 = vadd.f32 %v1711_v36, %v4854_v62  ;;  %v1950_v42 = vpop.f32.mrf.mxu0 }
 0x18c   : > { %v3551_v31 = vpop.f32.mrf.mxu1 }
 0x18d   : > { %v4971_v61 = vadd.f32 %v1937_v55, %v1788_v23  ;;  %v1793_v10 = vadd.f32 %v3551_v31, %v4860_v25  ;;  %v3586_v22 = vpop.f32.mrf.mxu0 }
 0x18e   : > { %v1724_v33 = vpop.f32.mrf.mxu1 }
 0x18f   : > { %v4974_v9 = vadd.f32 %v3585_v17, %v1793_v10  ;;  %v1791_v16 = vadd.f32 %v1724_v33, %v4863_v38  ;;  %v1953_v30 = vpop.f32.mrf.mxu0 }
 0x190   : > { %v3552_v47 = vpop.f32.mrf.mxu1 }
 0x191   : > { %v4977_v56 = vadd.f32 %v1950_v42, %v1791_v16  ;;  %v1794_v11 = vadd.f32 %v3552_v47, %v4874_v32  ;;  %v3589_v4 = vpop.f32.mrf.mxu0 }
 0x192   : > { %v1727_v62 = vpop.f32.mrf.mxu1 }
 0x193   : > { %v4980_v27 = vadd.f32 %v3586_v22, %v1794_v11  ;;  %v1792_v13 = vadd.f32 %v1727_v62, %v4881_v53  ;;  %v1966_v40 = vpop.f32.mrf.mxu0 }
 0x194   : > { %v3555_v25 = vpop.f32.mrf.mxu1 }
 0x195   : > { %v4983_v21 = vadd.f32 %v1953_v30, %v1792_v13  ;;  %v1797_v35 = vadd.f32 %v3555_v25, %v4888_v57  ;;  %v3590_v43 = vpop.f32.mrf.mxu0 }
 0x196   : > { %v1740_v38 = vpop.f32.mrf.mxu1 }
 0x197   : > { %v4986_v52 = vadd.f32 %v3589_v4, %v1797_v35  ;;  %v1795_v49 = vadd.f32 %v1740_v38, %v4891_v19  ;;  %v1969_v48 = vpop.f32.mrf.mxu0 }
 0x198   : > { %v3556_v32 = vpop.f32.mrf.mxu1 }
 0x199   : > { %v4989_v34 = vadd.f32 %v1966_v40, %v1795_v49  ;;  %v1798_v59 = vadd.f32 %v3556_v32, %v4895_v14  ;;  %v3593_v24 = vpop.f32.mrf.mxu0 }
 0x19a   : > { %v1743_v53 = vpop.f32.mrf.mxu1 }
 0x19b   : > { %5348 = vst [vmem:[#allocation9_spill] sm:$0xff] %v4989_v34  ;;  %v4992_v29 = vadd.f32 %v3590_v43, %v1798_v59  ;;  %v1796_v55 = vadd.f32 %v1743_v53, %v4899_v50  ;;  %v1982_v44 = vpop.f32.mrf.mxu0 }
 0x19c   : > { %v3559_v57 = vpop.f32.mrf.mxu1 }
 0x19d   : > { %v4995_v54 = vadd.f32 %v1969_v48, %v1796_v55  ;;  %v1801_v17 = vadd.f32 %v3559_v57, %v4902_v1  ;;  %v3594_v36 = vpop.f32.mrf.mxu0 }
 0x19e   : > { %v1756_v19 = vpop.f32.mrf.mxu1 }
 0x19f   : > { %5349 = vst [vmem:[#allocation7_spill] sm:$0xff] %v4995_v54  ;;  %v4998_v23 = vadd.f32 %v3593_v24, %v1801_v17  ;;  %v1799_v42 = vadd.f32 %v1756_v19, %v4905_v12  ;;  %v1985_v31 = vpop.f32.mrf.mxu0 }
 0x1a0   : > { %v3560_v14 = vpop.f32.mrf.mxu1 }
 0x1a1   : > { %v5001_v10 = vadd.f32 %v1982_v44, %v1799_v42  ;;  %v1802_v22 = vadd.f32 %v3560_v14, %v4908_v58  ;;  %v3633_v33 = vpop.f32.mrf.mxu0 }
 0x1a2   : > { %v1759_v50 = vpop.f32.mrf.mxu1 }
 0x1a3   : > { %5350 = vst [vmem:[#allocation11_spill] sm:$0xff] %v5001_v10  ;;  %v5004_v16 = vadd.f32 %v3594_v36, %v1802_v22  ;;  %v1800_v30 = vadd.f32 %v1759_v50, %v4911_v51  ;;  %v2288_v47 = vpop.f32.mrf.mxu0 }
 0x1a4   : > { %v3599_v1 = vpop.f32.mrf.mxu1 }
 0x1a5   : > { %v5007_v11 = vadd.f32 %v1985_v31, %v1800_v30  ;;  %v2213_v4 = vadd.f32 %v3599_v1, %v4914_v7  ;;  %v3634_v62 = vpop.f32.mrf.mxu0 }
 0x1a6   : > { %v2084_v12 = vpop.f32.mrf.mxu1 }
 0x1a7   : > { %5351 = vst [vmem:[#allocation13_spill] sm:$0xff] %v5007_v11  ;;  %v5010_v13 = vadd.f32 %v3633_v33, %v2213_v4  ;;  %v2211_v40 = vadd.f32 %v2084_v12, %v4917_v18  ;;  %v5013_v25 = vpop.f32.mrf.mxu0 }
 0x1a8   : > { %v3600_v58 = vpop.f32.mrf.mxu1 }
 0x1a9   : > { %v5015_v35 = vadd.f32 %v2288_v47, %v2211_v40  ;;  %v2214_v43 = vadd.f32 %v3600_v58, %v4920_v63  ;;  %v3637_v51 = vpop.f32.mrf.mxu0 }
 0x1aa   : > { %v5018_v38 = vpop.f32.mrf.mxu1 }
 0x1ab   : > { %v5020_v49 = vadd.f32 %v3634_v62, %v2214_v43  ;;  %v5022_v48 = vpop.f32.mrf.mxu0 }
 0x1ac   : > { %v3603_v7 = vpop.f32.mrf.mxu1 }
 0x1ad   : > { %v2217_v32 = vadd.f32 %v3603_v7, %v4926_v46  ;;  %v3638_v59 = vpop.f32.mrf.mxu0 }
 0x1ae   : > { %v5025_v24 = vpop.f32.mrf.mxu1 }
 0x1af   : > { %v5027_v18 = vadd.f32 %v3637_v51, %v2217_v32  ;;  %v5029_v53 = vpop.f32.mrf.mxu0 }
 0x1b0   : > { %v3604_v55 = vpop.f32.mrf.mxu1 }
 0x1b1   : > { %v2218_v63 = vadd.f32 %v3604_v55, %v4932_v3  ;;  %v3641_v44 = vpop.f32.mrf.mxu0 }
 0x1b2   : > { %v5032_v57 = vpop.f32.mrf.mxu1 }
 0x1b3   : > { %v5034_v17 = vadd.f32 %v3638_v59, %v2218_v63  ;;  %v5036_v36 = vpop.f32.mrf.mxu0 }
 0x1b4   : > { %v3607_v19 = vpop.f32.mrf.mxu1 }
 0x1b5   : > { %v2221_v46 = vadd.f32 %v3607_v19, %v4938_v15  ;;  %v3642_v42 = vpop.f32.mrf.mxu0 }
 0x1b6   : > { %v5039_v31 = vpop.f32.mrf.mxu1 }
 0x1b7   : > { %v5041_v14 = vadd.f32 %v3641_v44, %v2221_v46  ;;  %v5043_v22 = vpop.f32.mrf.mxu0 }
 0x1b8   : > { %v3608_v33 = vpop.f32.mrf.mxu1 }
 0x1b9   : > { %v2222_v3 = vadd.f32 %v3608_v33, %v4944_v41  ;;  %v3645_v50 = vpop.f32.mrf.mxu0 }
 0x1ba   : > { %v5046_v30 = vpop.f32.mrf.mxu1 }
 0x1bb   : > { %v5048_v47 = vadd.f32 %v3642_v42, %v2222_v3  ;;  %v5050_v1 = vpop.f32.mrf.mxu0 }
 0x1bc   : > { %v3611_v4 = vpop.f32.mrf.mxu1 }
 0x1bd   : > { %v2225_v15 = vadd.f32 %v3611_v4, %v4950_v5  ;;  %v3646_v62 = vpop.f32.mrf.mxu0 }
 0x1be   : > { %v5053_v12 = vpop.f32.mrf.mxu1 }
 0x1bf   : > { %v5055_v40 = vadd.f32 %v3645_v50, %v2225_v15  ;;  %v5057_v58 = vpop.f32.mrf.mxu0 }
 0x1c0   : > { %v3612_v43 = vpop.f32.mrf.mxu1 }
 0x1c1   : > { %v2226_v41 = vadd.f32 %v3612_v43, %v4956_v60  ;;  %v3649_v51 = vpop.f32.mrf.mxu0 }
 0x1c2   : > { %v5060_v7 = vpop.f32.mrf.mxu1 }
 0x1c3   : > { %v5062_v32 = vadd.f32 %v3646_v62, %v2226_v41  ;;  %v5064_v59 = vpop.f32.mrf.mxu0 }
 0x1c4   : > { %v3615_v55 = vpop.f32.mrf.mxu1 }
 0x1c5   : > { %v2229_v5 = vadd.f32 %v3615_v55, %v4962_v28  ;;  %v3650_v63 = vpop.f32.mrf.mxu0 }
 0x1c6   : > { %v5067_v44 = vpop.f32.mrf.mxu1 }
 0x1c7   : > { %v5069_v19 = vadd.f32 %v3649_v51, %v2229_v5  ;;  %v5071_v46 = vpop.f32.mrf.mxu0 }
 0x1c8   : > { %v3616_v42 = vpop.f32.mrf.mxu1 }
 0x1c9   : > { %v2230_v60 = vadd.f32 %v3616_v42, %v4968_v37  ;;  %v3653_v33 = vpop.f32.mrf.mxu0 }
 0x1ca   : > { %v5074_v3 = vpop.f32.mrf.mxu1 }
 0x1cb   : > { %v5076_v50 = vadd.f32 %v3650_v63, %v2230_v60  ;;  %v5078_v4 = vpop.f32.mrf.mxu0 }
 0x1cc   : > { %v3619_v15 = vpop.f32.mrf.mxu1 }
 0x1cd   : > { %v2233_v28 = vadd.f32 %v3619_v15, %v4974_v9  ;;  %v3654_v62 = vpop.f32.mrf.mxu0 }
 0x1ce   : > { %v5081_v43 = vpop.f32.mrf.mxu1 }
 0x1cf   : > { %v5083_v41 = vadd.f32 %v3653_v33, %v2233_v28  ;;  %v5085_v51 = vpop.f32.mrf.mxu0 }
 0x1d0   : > { %v3620_v55 = vpop.f32.mrf.mxu1 }
 0x1d1   : > { %v2234_v37 = vadd.f32 %v3620_v55, %v4980_v27  ;;  %v3657_v5 = vpop.f32.mrf.mxu0 }
 0x1d2   : > { %v5088_v42 = vpop.f32.mrf.mxu1 }
 0x1d3   : > { %v5090_v63 = vadd.f32 %v3654_v62, %v2234_v37  ;;  %v5092_v60 = vpop.f32.mrf.mxu0 }
 0x1d4   : > { %5353 = vst [vmem:[#allocation19_spill] sm:$0xff] %v5092_v60  ;;  %v3623_v11 = vpop.f32.mrf.mxu1 }
 0x1d5   : > { %5352 = vst [vmem:[#allocation15_spill] sm:$0xff] %v5090_v63  ;;  %v2237_v9 = vadd.f32 %v3623_v11, %v4986_v52  ;;  %v3658_v15 = vpop.f32.mrf.mxu0 }
 0x1d6   : > { %v5095_v10 = vpop.f32.mrf.mxu1 }
 0x1d7   : > { %v5097_v33 = vadd.f32 %v3657_v5, %v2237_v9  ;;  %v5099_v28 = vpop.f32.mrf.mxu0 }
 0x1d8   : > { %5355 = vst [vmem:[#allocation5_spill] sm:$0xff] %v5099_v28  ;;  %v3624_v54 = vpop.f32.mrf.mxu1 }
 0x1d9   : > { %5354 = vst [vmem:[#allocation24_spill] sm:$0xff] %v5097_v33  ;;  %v2238_v27 = vadd.f32 %v3624_v54, %v4992_v29  ;;  %v3661_v55 = vpop.f32.mrf.mxu0 }
 0x1da   : > { %v5102_v34 = vpop.f32.mrf.mxu1 }
 0x1db   : > { %v5104_v62 = vadd.f32 %v3658_v15, %v2238_v27  ;;  %v5106_v37 = vpop.f32.mrf.mxu0 }
 0x1dc   : > { %5357 = vst [vmem:[#allocation12_spill] sm:$0xff] %v5106_v37  ;;  %v3627_v60 = vpop.f32.mrf.mxu1 }
 0x1dd   : > { %5356 = vst [vmem:[#allocation10_spill] sm:$0xff] %v5104_v62  ;;  %v2241_v52 = vadd.f32 %v3627_v60, %v4998_v23  ;;  %v3662_v11 = vpop.f32.mrf.mxu0  ;;  %v2212_v23 = vadd.f32 %v5018_v38, %v4923_v6 }
 0x1de   : > { %v5109_v63 = vpop.f32.mrf.mxu1 }
 0x1df   : > { %5358 = vst [vmem:[#allocation14_spill] sm:$0xff] %v5109_v63  ;;  %v5111_v5 = vadd.f32 %v3661_v55, %v2241_v52  ;;  %v5113_v9 = vpop.f32.mrf.mxu0 }
 0x1e0   : > { %5360 = vst [vmem:[#allocation22_spill] sm:$0xff] %v5113_v9  ;;  %v3628_v28 = vpop.f32.mrf.mxu1 }
 0x1e1   : > { %5359 = vst [vmem:[#allocation17_spill] sm:$0xff] %v5111_v5  ;;  %v2242_v29 = vadd.f32 %v3628_v28, %v5004_v16  ;;  %v3701_v54 = vpop.f32.mrf.mxu0  ;;  %v2416_v16 = vadd.f32 %v5013_v25, %v2212_v23  ;;  %v2215_v28 = vadd.f32 %v5025_v24, %v4929_v8 }
 0x1e2   : > { %v5116_v33 = vpop.f32.mrf.mxu1 }
 0x1e3   : > { %5361 = vst [vmem:[#allocation25_spill] sm:$0xff] %v5116_v33  ;;  %v5118_v15 = vadd.f32 %v3662_v11, %v2242_v29  ;;  %v2728_v27 = vpop.f32.mrf.mxu0 }
 0x1e4   : > { %v3667_v37 = vpop.f32.mrf.mxu1 }
 0x1e5   : > { %5362 = vst [vmem:[#allocation2_spill] sm:$0xff] %v5118_v15  ;;  %v3702_v60 = vpop.f32.mrf.mxu0  ;;  %v2647_v55 = vadd.f32 %v3667_v37, %v5010_v13  ;;  %v5131_v13 = vld [vmem:[%s5228_s2] ss:$0 sm:$0xff] }
 0x1e6   : > { %v2518_v62 = vpop.f32.mrf.mxu1 }
 0x1e7   : > { %v2645_v52 = vadd.f32 %v2518_v62, %v5015_v35  ;;  %v2731_v9 = vpop.f32.mrf.mxu0  ;;  %v2857_v63 = vadd.f32 %v3701_v54, %v2647_v55  ;;  %v2419_v62 = vadd.f32 %v5022_v48, %v2215_v28  ;;  %v2219_v55 = vadd.f32 %v5039_v31, %v4941_v0 }
 0x1e8   : > { %v3668_v5 = vpop.f32.mrf.mxu1 }
 0x1e9   : > { %v2855_v11 = vadd.f32 %v2728_v27, %v2645_v52  ;;  %v2648_v29 = vadd.f32 %v3668_v5, %v5020_v49  ;;  %v3705_v15 = vpop.f32.mrf.mxu0  ;;  %v2216_v49 = vadd.f32 %v5032_v57, %v4935_v45 }
 0x1ea   : > { %v2521_v33 = vpop.f32.mrf.mxu1 }
 0x1eb   : > { %v2646_v6 = vadd.f32 %v2521_v33, %v2416_v16  ;;  %v2744_v38 = vpop.f32.mrf.mxu0  ;;  %v2894_v25 = vadd.f32 %v5131_v13, %v2855_v11  ;;  %v2858_v37 = vadd.f32 %v3702_v60, %v2648_v29  ;;  %v2896_v33 = vadd.f32 %v5131_v13, %v2857_v63 }
 0x1ec   : > { %v3671_v35 = vpop.f32.mrf.mxu1  ;;  %v2420_v45 = vadd.f32 %v5029_v53, %v2216_v49 }
 0x1ed   : > { %v2856_v8 = vadd.f32 %v2731_v9, %v2646_v6  ;;  %v3706_v24 = vpop.f32.mrf.mxu0  ;;  %v2651_v48 = vadd.f32 %v3671_v35, %v5027_v18  ;;  %v2926_v16 = vmax.f32 %v2894_v25, 0.0  ;;  %v2897_v9 = vadd.f32 %v5131_v13, %v2858_v37 }
 0x1ee   : > { %v2534_v5 = vpop.f32.mrf.mxu1  ;;  %v2928_v29 = vmax.f32 %v2896_v33, 0.0  ;;  %v2423_v35 = vadd.f32 %v5036_v36, %v2219_v55  ;;  %v2220_v25 = vadd.f32 %v5046_v30, %v4947_v20  ;;  %v2223_v20 = vadd.f32 %v5053_v12, %v4953_v26 }
 0x1ef   : > { %v2895_v54 = vadd.f32 %v5131_v13, %v2856_v8  ;;  %v2649_v27 = vadd.f32 %v2534_v5, %v2419_v62  ;;  %v2747_v23 = vpop.f32.mrf.mxu0  ;;  %v2861_v0 = vadd.f32 %v3705_v15, %v2651_v48  ;;  %v2224_v26 = vadd.f32 %v5060_v7, %v4959_v39 }
 0x1f0   : > { %v3672_v52 = vpop.f32.mrf.mxu1  ;;  %v2424_v55 = vadd.f32 %v5043_v22, %v2220_v25  ;;  %v2227_v39 = vadd.f32 %v5067_v44, %v4965_v2  ;;  %v2228_v2 = vadd.f32 %v5074_v3, %v4971_v61  ;;  %v2231_v61 = vadd.f32 %v5081_v43, %v4977_v56 }
 0x1f1   : > { %v2927_v60 = vmax.f32 %v2895_v54, 0.0  ;;  %v2859_v28 = vadd.f32 %v2744_v38, %v2649_v27  ;;  %v3709_v11 = vpop.f32.mrf.mxu0  ;;  %v2652_v57 = vadd.f32 %v3672_v52, %v5034_v17  ;;  %v2929_v38 = vmax.f32 %v2897_v9, 0.0 }
 0x1f2   : > { %v2537_v63 = vpop.f32.mrf.mxu1  ;;  %v2232_v56 = vadd.f32 %v5088_v42, %v4983_v21  ;;  %v5363_v21 = vld [vmem:[#allocation9_spill] sm:$0xff] }
 0x1f3   : > { %v2958_v6 = vadd.f32 %v2927_v60, %v2926_v16  ;;  %v2898_v62 = vadd.f32 %v5131_v13, %v2859_v28  ;;  %v2760_v8 = vpop.f32.mrf.mxu0  ;;  %v2650_v31 = vadd.f32 %v2537_v63, %v2420_v45  ;;  %v2862_v53 = vadd.f32 %v3706_v24, %v2652_v57 }
 0x1f4   : > { %v3675_v18 = vpop.f32.mrf.mxu1  ;;  %v2900_v16 = vadd.f32 %v5131_v13, %v2861_v0  ;;  %v2427_v0 = vadd.f32 %v5050_v1, %v2223_v20  ;;  %v2235_v42 = vadd.f32 %v5095_v10, %v5363_v21  ;;  %v5366_v10 = vld [vmem:[#allocation7_spill] sm:$0xff] }
 0x1f5   : > { %v2959_v37 = vadd.f32 %v2958_v6, %v2928_v29  ;;  %v3710_v5 = vpop.f32.mrf.mxu0  ;;  %v2860_v49 = vadd.f32 %v2747_v23, %v2650_v31  ;;  %v2930_v54 = vmax.f32 %v2898_v62, 0.0  ;;  %v2655_v48 = vadd.f32 %v3675_v18, %v5041_v14 }
 0x1f6   : > { %v2550_v17 = vpop.f32.mrf.mxu1  ;;  %v2901_v9 = vadd.f32 %v5131_v13, %v2862_v53  ;;  %v2932_v29 = vmax.f32 %v2900_v16, 0.0 }
 0x1f7   : > { %v2960_v33 = vadd.f32 %v2959_v37, %v2929_v38  ;;  %v2653_v27 = vadd.f32 %v2550_v17, %v2423_v35  ;;  %v2763_v52 = vpop.f32.mrf.mxu0  ;;  %v2899_v15 = vadd.f32 %v5131_v13, %v2860_v49  ;;  %v2865_v14 = vadd.f32 %v3709_v11, %v2655_v48 }
 0x1f8   : > { %v3676_v36 = vpop.f32.mrf.mxu1  ;;  %v2933_v31 = vmax.f32 %v2901_v9, 0.0 }
 0x1f9   : > { %v2961_v30 = vadd.f32 %v2960_v33, %v2930_v54  ;;  %v2863_v24 = vadd.f32 %v2760_v8, %v2653_v27  ;;  %v3713_v23 = vpop.f32.mrf.mxu0  ;;  %v2931_v60 = vmax.f32 %v2899_v15, 0.0  ;;  %v2656_v28 = vadd.f32 %v3676_v36, %v5048_v47 }
 0x1fa   : > { %v2553_v45 = vpop.f32.mrf.mxu1  ;;  %v2904_v11 = vadd.f32 %v5131_v13, %v2865_v14  ;;  %v2428_v54 = vadd.f32 %v5057_v58, %v2224_v26 }
 0x1fb   : > { %v2654_v57 = vadd.f32 %v2553_v45, %v2424_v55  ;;  %v2776_v63 = vpop.f32.mrf.mxu0  ;;  %v2962_v6 = vadd.f32 %v2961_v30, %v2931_v60  ;;  %v2902_v62 = vadd.f32 %v5131_v13, %v2863_v24  ;;  %v2866_v35 = vadd.f32 %v3710_v5, %v2656_v28 }
 0x1fc   : > { %v3679_v22 = vpop.f32.mrf.mxu1  ;;  %v2936_v55 = vmax.f32 %v2904_v11, 0.0  ;;  %v2431_v24 = vadd.f32 %v5064_v59, %v2227_v39  ;;  %v2435_v11 = vadd.f32 %v5078_v4, %v2231_v61 }
 0x1fd   : > { %v2864_v12 = vadd.f32 %v2763_v52, %v2654_v57  ;;  %v3714_v8 = vpop.f32.mrf.mxu0  ;;  %v2963_v18 = vadd.f32 %v2962_v6, %v2932_v29  ;;  %v2934_v53 = vmax.f32 %v2902_v62, 0.0  ;;  %v2659_v17 = vadd.f32 %v3679_v22, %v5055_v40 }
 0x1fe   : > { %v2566_v47 = vpop.f32.mrf.mxu1  ;;  %v2905_v52 = vadd.f32 %v5131_v13, %v2866_v35  ;;  %v2432_v22 = vadd.f32 %v5071_v46, %v2228_v2 }
 0x1ff   : > { %v2903_v25 = vadd.f32 %v5131_v13, %v2864_v12  ;;  %v2657_v38 = vadd.f32 %v2566_v47, %v2427_v0  ;;  %v2779_v37 = vpop.f32.mrf.mxu0  ;;  %v2964_v49 = vadd.f32 %v2963_v18, %v2933_v31  ;;  %v2869_v40 = vadd.f32 %v3713_v23, %v2659_v17 }
 0x200   : > { %v3680_v1 = vpop.f32.mrf.mxu1  ;;  %v2937_v60 = vmax.f32 %v2905_v52, 0.0 }
 0x201   : > { %v2935_v7 = vmax.f32 %v2903_v25, 0.0  ;;  %v2867_v33 = vadd.f32 %v2776_v63, %v2657_v38  ;;  %v3717_v5 = vpop.f32.mrf.mxu0  ;;  %v2965_v27 = vadd.f32 %v2964_v49, %v2934_v53  ;;  %v2660_v16 = vadd.f32 %v3680_v1, %v5062_v32 }
 0x202   : > { %v2569_v15 = vpop.f32.mrf.mxu1  ;;  %v2908_v23 = vadd.f32 %v5131_v13, %v2869_v40  ;;  %v5364_v40 = vld [vmem:[#allocation15_spill] sm:$0xff] }
 0x203   : > { %v2658_v48 = vadd.f32 %v2569_v15, %v2428_v54  ;;  %v2792_v36 = vpop.f32.mrf.mxu0  ;;  %v2966_v20 = vadd.f32 %v2965_v27, %v2935_v7  ;;  %v2906_v30 = vadd.f32 %v5131_v13, %v2867_v33  ;;  %v2870_v45 = vadd.f32 %v3714_v8, %v2660_v16 }
 0x204   : > { %v3683_v58 = vpop.f32.mrf.mxu1  ;;  %v2940_v25 = vmax.f32 %v2908_v23, 0.0  ;;  %v2436_v16 = vadd.f32 %v5085_v51, %v2232_v56 }
 0x205   : > { %v2868_v44 = vadd.f32 %v2779_v37, %v2658_v48  ;;  %v3718_v9 = vpop.f32.mrf.mxu0  ;;  %v2967_v28 = vadd.f32 %v2966_v20, %v2936_v55  ;;  %v2938_v6 = vmax.f32 %v2906_v30, 0.0  ;;  %v2663_v62 = vadd.f32 %v3683_v58, %v5069_v19 }
 0x206   : > { %v2582_v32 = vpop.f32.mrf.mxu1  ;;  %v2909_v8 = vadd.f32 %v5131_v13, %v2870_v45 }
 0x207   : > { %v2907_v57 = vadd.f32 %v5131_v13, %v2868_v44  ;;  %v2661_v63 = vadd.f32 %v2582_v32, %v2431_v24  ;;  %v2795_v29 = vpop.f32.mrf.mxu0  ;;  %v2968_v14 = vadd.f32 %v2967_v28, %v2937_v60  ;;  %v2873_v19 = vadd.f32 %v3717_v5, %v2663_v62  ;;  %v5365_v28 = vld [vmem:[#allocation19_spill] sm:$0xff] }
 0x208   : > { %v3684_v59 = vpop.f32.mrf.mxu1  ;;  %v2941_v49 = vmax.f32 %v2909_v8, 0.0  ;;  %v2439_v45 = vadd.f32 %v5365_v28, %v2235_v42  ;;  %v2236_v32 = vadd.f32 %v5102_v34, %v5366_v10  ;;  %v5369_v34 = vld [vmem:[#allocation11_spill] sm:$0xff] }
 0x209   : > { %v2939_v3 = vmax.f32 %v2907_v57, 0.0  ;;  %v2871_v0 = vadd.f32 %v2792_v36, %v2661_v63  ;;  %v3721_v26 = vpop.f32.mrf.mxu0  ;;  %v2969_v12 = vadd.f32 %v2968_v14, %v2938_v6  ;;  %v2664_v31 = vadd.f32 %v3684_v59, %v5076_v50 }
 0x20a   : > { %v2585_v18 = vpop.f32.mrf.mxu1  ;;  %v2912_v33 = vadd.f32 %v5131_v13, %v2873_v19 }
 0x20b   : > { %v2662_v35 = vadd.f32 %v2585_v18, %v2432_v22  ;;  %v2808_v47 = vpop.f32.mrf.mxu0  ;;  %v2970_v38 = vadd.f32 %v2969_v12, %v2939_v3  ;;  %v2910_v37 = vadd.f32 %v5131_v13, %v2871_v0  ;;  %v2874_v1 = vadd.f32 %v3718_v9, %v2664_v31  ;;  %v5368_v31 = vld [vmem:[#allocation5_spill] sm:$0xff] }
 0x20c   : > { %v3687_v46 = vpop.f32.mrf.mxu1  ;;  %v2944_v44 = vmax.f32 %v2912_v33, 0.0  ;;  %v2440_v18 = vadd.f32 %v5368_v31, %v2236_v32 }
 0x20d   : > { %v2872_v43 = vadd.f32 %v2795_v29, %v2662_v35  ;;  %v3722_v53 = vpop.f32.mrf.mxu0  ;;  %v2971_v17 = vadd.f32 %v2970_v38, %v2940_v25  ;;  %v2942_v5 = vmax.f32 %v2910_v37, 0.0  ;;  %v2667_v52 = vadd.f32 %v3687_v46, %v5083_v41  ;;  %v5370_v35 = vld [vmem:[#allocation14_spill] sm:$0xff] }
 0x20e   : > { %v2598_v50 = vpop.f32.mrf.mxu1  ;;  %v2913_v20 = vadd.f32 %v5131_v13, %v2874_v1 }
 0x20f   : > { %v2911_v54 = vadd.f32 %v5131_v13, %v2872_v43  ;;  %v2665_v39 = vadd.f32 %v2598_v50, %v2435_v11  ;;  %v2811_v7 = vpop.f32.mrf.mxu0  ;;  %v2972_v27 = vadd.f32 %v2971_v17, %v2941_v49  ;;  %v2877_v41 = vadd.f32 %v3721_v26, %v2667_v52  ;;  %v5367_v26 = vld [vmem:[#allocation24_spill] sm:$0xff]  ;;  %v5371_v11 = vld [vmem:[#allocation10_spill] sm:$0xff] }
 0x210   : > { %v3688_v4 = vpop.f32.mrf.mxu1  ;;  %v2945_v29 = vmax.f32 %v2913_v20, 0.0 }
 0x211   : > { %v2943_v15 = vmax.f32 %v2911_v54, 0.0  ;;  %v2875_v48 = vadd.f32 %v2808_v47, %v2665_v39  ;;  %v3725_v36 = vpop.f32.mrf.mxu0  ;;  %v2973_v55 = vadd.f32 %v2972_v27, %v2942_v5  ;;  %v2668_v30 = vadd.f32 %v3688_v4, %v5364_v40  ;;  %v5373_v5 = vld [vmem:[#allocation13_spill] sm:$0xff] }
 0x212   : > { %v2601_v58 = vpop.f32.mrf.mxu1  ;;  %v2916_v61 = vadd.f32 %v5131_v13, %v2877_v41  ;;  %v2239_v47 = vadd.f32 %v5370_v35, %v5369_v34  ;;  %v5374_v27 = vld [vmem:[#allocation25_spill] sm:$0xff] }
 0x213   : > { %v2666_v24 = vadd.f32 %v2601_v58, %v2436_v16  ;;  %v2824_v2 = vpop.f32.mrf.mxu0  ;;  %v2974_v9 = vadd.f32 %v2973_v55, %v2943_v15  ;;  %v2914_v60 = vadd.f32 %v5131_v13, %v2875_v48  ;;  %v2878_v6 = vadd.f32 %v3722_v53, %v2668_v30  ;;  %v5375_v30 = vld [vmem:[#allocation17_spill] sm:$0xff] }
 0x214   : > { %v3691_v51 = vpop.f32.mrf.mxu1  ;;  %v2948_v49 = vmax.f32 %v2916_v61, 0.0  ;;  %v2240_v52 = vadd.f32 %v5374_v27, %v5373_v5 }
 0x215   : > { %v2876_v57 = vadd.f32 %v2811_v7, %v2666_v24  ;;  %v3726_v63 = vpop.f32.mrf.mxu0  ;;  %v2975_v23 = vadd.f32 %v2974_v9, %v2944_v44  ;;  %v2946_v3 = vmax.f32 %v2914_v60, 0.0  ;;  %v2671_v12 = vadd.f32 %v3691_v51, %v5367_v26  ;;  %v5372_v7 = vld [vmem:[#allocation12_spill] sm:$0xff]  ;;  %v5376_v44 = vld [vmem:[#allocation22_spill] sm:$0xff] }
 0x216   : > { %v2614_v14 = vpop.f32.mrf.mxu1  ;;  %v2917_v46 = vadd.f32 %v5131_v13, %v2878_v6  ;;  %v2443_v33 = vadd.f32 %v5372_v7, %v2239_v47  ;;  %v2444_v9 = vadd.f32 %v5376_v44, %v2240_v52 }
 0x217   : > { %v2915_v62 = vadd.f32 %v5131_v13, %v2876_v57  ;;  %v2669_v59 = vadd.f32 %v2614_v14, %v2439_v45  ;;  %v2827_v22 = vpop.f32.mrf.mxu0  ;;  %v2976_v0 = vadd.f32 %v2975_v23, %v2945_v29  ;;  %v2881_v1 = vadd.f32 %v3725_v36, %v2671_v12  ;;  %v5377_v45 = vld [vmem:[#allocation2_spill] sm:$0xff] }
 0x218   : > { %v3692_v8 = vpop.f32.mrf.mxu1  ;;  %v2949_v16 = vmax.f32 %v2917_v46, 0.0 }
 0x219   : > { %v2947_v25 = vmax.f32 %v2915_v62, 0.0  ;;  %v2879_v38 = vadd.f32 %v2824_v2, %v2669_v59  ;;  %v3729_v19 = vpop.f32.mrf.mxu0  ;;  %v2977_v37 = vadd.f32 %v2976_v0, %v2946_v3  ;;  %v2672_v56 = vadd.f32 %v3692_v8, %v5371_v11 }
 0x21a   : > { %v2617_v43 = vpop.f32.mrf.mxu1  ;;  %v2920_v20 = vadd.f32 %v5131_v13, %v2881_v1 }
 0x21b   : > { %v2670_v53 = vadd.f32 %v2617_v43, %v2440_v18  ;;  %v2978_v17 = vadd.f32 %v2977_v37, %v2947_v25  ;;  %v2918_v50 = vadd.f32 %v5131_v13, %v2879_v38  ;;  %v2840_v39 = vpop.f32.mrf.mxu0  ;;  %v2882_v42 = vadd.f32 %v3726_v63, %v2672_v56 }
 0x21c   : > { %v3695_v54 = vpop.f32.mrf.mxu1  ;;  %v2952_v63 = vmax.f32 %v2920_v20, 0.0 }
 0x21d   : > { %v2880_v4 = vadd.f32 %v2827_v22, %v2670_v53  ;;  %v2979_v21 = vadd.f32 %v2978_v17, %v2948_v49  ;;  %v2950_v36 = vmax.f32 %v2918_v50, 0.0  ;;  %v2675_v58 = vadd.f32 %v3695_v54, %v5375_v30  ;;  %v3730_v2 = vpop.f32.mrf.mxu0 }
 0x21e   : > { %v2630_v15 = vpop.f32.mrf.mxu1  ;;  %v2921_v28 = vadd.f32 %v5131_v13, %v2882_v42 }
 0x21f   : > { %v2919_v48 = vadd.f32 %v5131_v13, %v2880_v4  ;;  %v2673_v55 = vadd.f32 %v2630_v15, %v2443_v33  ;;  %v2980_v40 = vadd.f32 %v2979_v21, %v2949_v16  ;;  %v2885_v23 = vadd.f32 %v3729_v19, %v2675_v58  ;;  %v2843_v14 = vpop.f32.mrf.mxu0 }
 0x220   : > { %v3696_v24 = vpop.f32.mrf.mxu1  ;;  %v2953_v59 = vmax.f32 %v2921_v28, 0.0 }
 0x221   : > { %v2951_v41 = vmax.f32 %v2919_v48, 0.0  ;;  %v2883_v60 = vadd.f32 %v2840_v39, %v2673_v55  ;;  %v2981_v51 = vadd.f32 %v2980_v40, %v2950_v36  ;;  %v2676_v10 = vadd.f32 %v3696_v24, %v5377_v45 }
 0x222   : > { %v2633_v32 = vpop.f32.mrf.mxu1  ;;  %v2924_v0 = vadd.f32 %v5131_v13, %v2885_v23 }
 0x223   : > { %v2674_v57 = vadd.f32 %v2633_v32, %v2444_v9  ;;  %v2982_v29 = vadd.f32 %v2981_v51, %v2951_v41  ;;  %v2922_v6 = vadd.f32 %v5131_v13, %v2883_v60  ;;  %v2886_v61 = vadd.f32 %v3730_v2, %v2676_v10 }
 0x224   : > { %v2956_v34 = vmax.f32 %v2924_v0, 0.0 }
 0x225   : > { %v2884_v62 = vadd.f32 %v2843_v14, %v2674_v57  ;;  %v2983_v22 = vadd.f32 %v2982_v29, %v2952_v63  ;;  %v2954_v26 = vmax.f32 %v2922_v6, 0.0  ;;  %v2925_v18 = vadd.f32 %v5131_v13, %v2886_v61 }
 0x227   : > { %v2923_v3 = vadd.f32 %v5131_v13, %v2884_v62  ;;  %v2984_v12 = vadd.f32 %v2983_v22, %v2953_v59  ;;  %v2957_v47 = vmax.f32 %v2925_v18, 0.0 }
 0x229   : > { %v2955_v8 = vmax.f32 %v2923_v3, 0.0  ;;  %v2985_v31 = vadd.f32 %v2984_v12, %v2954_v26 }
 0x22b   : > { %v2986_v35 = vadd.f32 %v2985_v31, %v2955_v8 }
 0x22d   : > { %v2987_v25 = vadd.f32 %v2986_v35, %v2956_v34 }
 0x22f   : > { %v2988_v38 = vadd.f32 %v2987_v25, %v2957_v47 }
 0x231   : > { %v2989_v19 = vrot.slane %v2988_v38, 4 }
 0x233   : > { %v2990_v37 = vadd.f32 %v2989_v19, %v2988_v38 }
 0x235   : > { %v2991_v46 = vrot.slane %v2990_v37, 2 }
 0x237   : > { %v2992_v11 = vadd.f32 %v2991_v46, %v2990_v37 }
 0x239   : > { %v2993_v56 = vrot.slane %v2992_v11, 1 }
 0x23b   : > { %v2994_v43 = vadd.f32 %v2993_v56, %v2992_v11 }
 0x23d   : > { %2995 = vst [vmem:[%s166_s5] sm:$0x1] %v2994_v43 }
 0x23e PF: > { %s13_s12 = sadd.s32 1, %s3780_s12  }
 0x23f   : > { %p10_p4 = scmp.ge.s32.totalorder %s13_s12, 4  }
 0x241   :  { %12 = sbr.rel (!%p10_p4) target bundleno = 1 (0x1), region = 62 }

</bundles_post_ra>
